<compile_context>
chip_gen: v6e
topology: v6e:2x2x1
jax: 0.10.0
libtpu: 0.0.40
codegen_flags: <defaults>
</compile_context>

<pallas_src>
import jax
import jax.numpy as jnp
from jax import lax
from jax.experimental import pallas as pl
from jax.experimental.pallas import tpu as pltpu


def _lstm_last_kernel(x_ref, wih_ref, whh_ref, b_ref, out_ref):
    """LSTM over the full sequence in one invocation.

    x_ref   : (T*Bp, D)  time-major-flattened, batch-padded inputs
    wih_ref : (D, 4H)    input weights, transposed, gate order [i, f, o, g]
    whh_ref : (H, 4H)    recurrent weights, transposed, gate order [i, f, o, g]
    b_ref   : (1, 4H)    fused bias (b_ih + b_hh), gate order [i, f, o, g]
    out_ref : (Bp, H)    final hidden state h_T
    """
    Bp, H = out_ref.shape
    TBp, _ = x_ref.shape
    T = TBp // Bp

    # ---- Phase 1: hoisted input projection (one big MXU matmul; bias added once). ----
    gx = (
        jnp.dot(x_ref[...], wih_ref[...], preferred_element_type=jnp.float32)
        + b_ref[...]
    )  # (T*Bp, 4H)

    whh = whh_ref[...]  # (H, 4H), resident for the whole recurrence

    # ---- Phase 2: serial recurrence, fully unrolled (T is static & small). ----
    # TODO(synk): for very long sequences, chunk the unroll to bound compile time.
    h = jnp.zeros((Bp, H), jnp.float32)
    c = jnp.zeros((Bp, H), jnp.float32)
    for t in range(T):
        gates = gx[t * Bp:(t + 1) * Bp, :] + jnp.dot(
            h, whh, preferred_element_type=jnp.float32
        )  # (Bp, 4H)

        sig = jax.nn.sigmoid(gates[:, 0:3 * H])        # contiguous [i | f | o] slab
        i_g = sig[:, 0 * H:1 * H]
        f_g = sig[:, 1 * H:2 * H]
        o_g = sig[:, 2 * H:3 * H]
        g_g = jnp.tanh(gates[:, 3 * H:4 * H])          # single tanh slab

        c = f_g * c + i_g * g_g
        h = o_g * jnp.tanh(c)

    out_ref[...] = h.astype(out_ref.dtype)


@jax.jit
def accumulator_forward(x, w_ih, w_hh, b_ih, b_hh):
    """x: (B, T, D) float32, batch-first (PyTorch layout).  Returns (B, H) == output[:, -1, :]."""
    B, T, D = x.shape
    H = w_hh.shape[1]

    # Pad the batch dim to the 8-sublane granularity (full vregs inside the kernel).
    Bp = max(8, ((B + 7) // 8) * 8)

    # Gate-row permutation: PyTorch order [i, f, g, o] -> kernel order [i, f, o, g].
    def _reorder(w):
        i, f, g, o = jnp.split(w, 4, axis=0)
        return jnp.concatenate([i, f, o, g], axis=0)

    w_ih_t = _reorder(w_ih).T                         # (D, 4H)
    w_hh_t = _reorder(w_hh).T                         # (H, 4H)
    bias = _reorder(b_ih + b_hh).reshape(1, 4 * H)    # (1, 4H)

    # Time-major, batch-padded, flattened inputs: rows [t*Bp, (t+1)*Bp) are step t.
    x_pad = jnp.pad(x, ((0, Bp - B), (0, 0), (0, 0)))
    x_flat = jnp.transpose(x_pad, (1, 0, 2)).reshape(T * Bp, D)

    out = pl.pallas_call(
        _lstm_last_kernel,
        out_shape=jax.ShapeDtypeStruct((Bp, H), x.dtype),
    )(x_flat, w_ih_t, w_hh_t, bias)
    return out[:B]


def _reference_lstm_last(x, w_ih, w_hh, b_ih, b_hh):
    """Pure-JAX reference of PyTorch nn.LSTM forward (batch_first), returns h_T."""
    B, T, D = x.shape
    H = w_hh.shape[1]
    bias = b_ih + b_hh

    def step(carry, x_t):
        h, c = carry
        gates = x_t @ w_ih.T + h @ w_hh.T + bias
        i = jax.nn.sigmoid(gates[:, 0 * H:1 * H])
        f = jax.nn.sigmoid(gates[:, 1 * H:2 * H])
        g = jnp.tanh(gates[:, 2 * H:3 * H])
        o = jax.nn.sigmoid(gates[:, 3 * H:4 * H])
        c = f * c + i * g
        h = o * jnp.tanh(c)
        return (h, c), None

    h0 = jnp.zeros((B, H), jnp.float32)
    c0 = jnp.zeros((B, H), jnp.float32)
    (h_T, _), _ = lax.scan(step, (h0, c0), jnp.transpose(x, (1, 0, 2)))
    return h_T


if __name__ == "__main__":
    # Small shapes consistent with the module: input_size=512 (hardcoded), dim=H=128.
    B, T, D, H = 2, 8, 512, 128

    key = jax.random.PRNGKey(0)
    kx, k1, k2, k3, k4 = jax.random.split(key, 5)

    # PyTorch LSTM init: U(-1/sqrt(H), 1/sqrt(H)), gate order [i, f, g, o].
    bound = 1.0 / (H ** 0.5)
    x = jax.random.normal(kx, (B, T, D), jnp.float32)
    w_ih = jax.random.uniform(k1, (4 * H, D), jnp.float32, -bound, bound)
    w_hh = jax.random.uniform(k2, (4 * H, H), jnp.float32, -bound, bound)
    b_ih = jax.random.uniform(k3, (4 * H,), jnp.float32, -bound, bound)
    b_hh = jax.random.uniform(k4, (4 * H,), jnp.float32, -bound, bound)

    out = accumulator_forward(x, w_ih, w_hh, b_ih, b_hh)
    out = jax.block_until_ready(out)

    ref = _reference_lstm_last(x, w_ih, w_hh, b_ih, b_hh)
    assert out.shape == (B, H), out.shape
    assert jnp.allclose(out, ref, atol=1e-4, rtol=1e-4), float(jnp.max(jnp.abs(out - ref)))

    print("KERNEL_OK")
</pallas_src>

<mosaic_0001>
module attributes {stable_mosaic.version = 11 : i64} {
  func.func @_lstm_last_kernel(%arg0: memref<64x512xf32, #tpu.memory_space<vmem>>, %arg1: memref<512x512xf32, #tpu.memory_space<vmem>>, %arg2: memref<128x512xf32, #tpu.memory_space<vmem>>, %arg3: memref<1x512xf32, #tpu.memory_space<vmem>>, %arg4: memref<8x128xf32, #tpu.memory_space<vmem>>) attributes {dimension_semantics = [], scalar_prefetch = 0 : i64, scratch_operands = 0 : i64, tpu.core_type = #tpu.core_type<tc>} {
    %c0 = arith.constant 0 : index
    %c0_0 = arith.constant 0 : index
    %0 = vector.load %arg0[%c0, %c0_0] : memref<64x512xf32, #tpu.memory_space<vmem>>, vector<64x512xf32>
    %c0_1 = arith.constant 0 : index
    %c0_2 = arith.constant 0 : index
    %1 = vector.load %arg1[%c0_1, %c0_2] : memref<512x512xf32, #tpu.memory_space<vmem>>, vector<512x512xf32>
    %cst = arith.constant dense<0.000000e+00> : vector<64x512xf32>
    %2 = tpu.matmul %0, %1, %cst {dimension_numbers = #tpu.dot_dimension_numbers<[1], [0], [0], [1], [0, 0, 1, 1], [], []>} : vector<64x512xf32>, vector<512x512xf32>, vector<64x512xf32> -> vector<64x512xf32>
    %c0_3 = arith.constant 0 : index
    %c0_4 = arith.constant 0 : index
    %3 = vector.load %arg3[%c0_3, %c0_4] : memref<1x512xf32, #tpu.memory_space<vmem>>, vector<1x512xf32>
    %4 = vector.broadcast %3 : vector<1x512xf32> to vector<64x512xf32>
    %5 = arith.addf %2, %4 : vector<64x512xf32>
    %c0_5 = arith.constant 0 : index
    %c0_6 = arith.constant 0 : index
    %6 = vector.load %arg2[%c0_5, %c0_6] : memref<128x512xf32, #tpu.memory_space<vmem>>, vector<128x512xf32>
    %cst_7 = arith.constant 0.000000e+00 : f32
    %7 = vector.broadcast %cst_7 : f32 to vector<8x128xf32>
    %cst_8 = arith.constant 0.000000e+00 : f32
    %8 = vector.broadcast %cst_8 : f32 to vector<8x128xf32>
    %9 = vector.extract_strided_slice %5 {offsets = [0, 0], sizes = [8, 512], strides = [1, 1]} : vector<64x512xf32> to vector<8x512xf32>
    %cst_9 = arith.constant dense<0.000000e+00> : vector<8x512xf32>
    %10 = tpu.matmul %7, %6, %cst_9 {dimension_numbers = #tpu.dot_dimension_numbers<[1], [0], [0], [1], [0, 0, 1, 1], [], []>} : vector<8x128xf32>, vector<128x512xf32>, vector<8x512xf32> -> vector<8x512xf32>
    %11 = arith.addf %9, %10 : vector<8x512xf32>
    %12 = vector.extract_strided_slice %11 {offsets = [0, 0], sizes = [8, 384], strides = [1, 1]} : vector<8x512xf32> to vector<8x384xf32>
    %13 = arith.negf %12 : vector<8x384xf32>
    %14 = math.exp %13 : vector<8x384xf32>
    %cst_10 = arith.constant 1.000000e+00 : f32
    %15 = vector.broadcast %cst_10 : f32 to vector<8x384xf32>
    %16 = arith.addf %15, %14 : vector<8x384xf32>
    %17 = arith.divf %15, %16 : vector<8x384xf32>
    %18 = vector.extract_strided_slice %17 {offsets = [0, 0], sizes = [8, 128], strides = [1, 1]} : vector<8x384xf32> to vector<8x128xf32>
    %19 = vector.extract_strided_slice %17 {offsets = [0, 128], sizes = [8, 128], strides = [1, 1]} : vector<8x384xf32> to vector<8x128xf32>
    %20 = vector.extract_strided_slice %17 {offsets = [0, 256], sizes = [8, 128], strides = [1, 1]} : vector<8x384xf32> to vector<8x128xf32>
    %21 = vector.extract_strided_slice %11 {offsets = [0, 384], sizes = [8, 128], strides = [1, 1]} : vector<8x512xf32> to vector<8x128xf32>
    %22 = math.tanh %21 : vector<8x128xf32>
    %23 = arith.mulf %19, %8 : vector<8x128xf32>
    %24 = arith.mulf %18, %22 : vector<8x128xf32>
    %25 = arith.addf %23, %24 : vector<8x128xf32>
    %26 = math.tanh %25 : vector<8x128xf32>
    %27 = arith.mulf %20, %26 : vector<8x128xf32>
    %28 = vector.extract_strided_slice %5 {offsets = [8, 0], sizes = [8, 512], strides = [1, 1]} : vector<64x512xf32> to vector<8x512xf32>
    %cst_11 = arith.constant dense<0.000000e+00> : vector<8x512xf32>
    %29 = tpu.matmul %27, %6, %cst_11 {dimension_numbers = #tpu.dot_dimension_numbers<[1], [0], [0], [1], [0, 0, 1, 1], [], []>} : vector<8x128xf32>, vector<128x512xf32>, vector<8x512xf32> -> vector<8x512xf32>
    %30 = arith.addf %28, %29 : vector<8x512xf32>
    %31 = vector.extract_strided_slice %30 {offsets = [0, 0], sizes = [8, 384], strides = [1, 1]} : vector<8x512xf32> to vector<8x384xf32>
    %32 = arith.negf %31 : vector<8x384xf32>
    %33 = math.exp %32 : vector<8x384xf32>
    %cst_12 = arith.constant 1.000000e+00 : f32
    %34 = vector.broadcast %cst_12 : f32 to vector<8x384xf32>
    %35 = arith.addf %34, %33 : vector<8x384xf32>
    %36 = arith.divf %34, %35 : vector<8x384xf32>
    %37 = vector.extract_strided_slice %36 {offsets = [0, 0], sizes = [8, 128], strides = [1, 1]} : vector<8x384xf32> to vector<8x128xf32>
    %38 = vector.extract_strided_slice %36 {offsets = [0, 128], sizes = [8, 128], strides = [1, 1]} : vector<8x384xf32> to vector<8x128xf32>
    %39 = vector.extract_strided_slice %36 {offsets = [0, 256], sizes = [8, 128], strides = [1, 1]} : vector<8x384xf32> to vector<8x128xf32>
    %40 = vector.extract_strided_slice %30 {offsets = [0, 384], sizes = [8, 128], strides = [1, 1]} : vector<8x512xf32> to vector<8x128xf32>
    %41 = math.tanh %40 : vector<8x128xf32>
    %42 = arith.mulf %38, %25 : vector<8x128xf32>
    %43 = arith.mulf %37, %41 : vector<8x128xf32>
    %44 = arith.addf %42, %43 : vector<8x128xf32>
    %45 = math.tanh %44 : vector<8x128xf32>
    %46 = arith.mulf %39, %45 : vector<8x128xf32>
    %47 = vector.extract_strided_slice %5 {offsets = [16, 0], sizes = [8, 512], strides = [1, 1]} : vector<64x512xf32> to vector<8x512xf32>
    %cst_13 = arith.constant dense<0.000000e+00> : vector<8x512xf32>
    %48 = tpu.matmul %46, %6, %cst_13 {dimension_numbers = #tpu.dot_dimension_numbers<[1], [0], [0], [1], [0, 0, 1, 1], [], []>} : vector<8x128xf32>, vector<128x512xf32>, vector<8x512xf32> -> vector<8x512xf32>
    %49 = arith.addf %47, %48 : vector<8x512xf32>
    %50 = vector.extract_strided_slice %49 {offsets = [0, 0], sizes = [8, 384], strides = [1, 1]} : vector<8x512xf32> to vector<8x384xf32>
    %51 = arith.negf %50 : vector<8x384xf32>
    %52 = math.exp %51 : vector<8x384xf32>
    %cst_14 = arith.constant 1.000000e+00 : f32
    %53 = vector.broadcast %cst_14 : f32 to vector<8x384xf32>
    %54 = arith.addf %53, %52 : vector<8x384xf32>
    %55 = arith.divf %53, %54 : vector<8x384xf32>
    %56 = vector.extract_strided_slice %55 {offsets = [0, 0], sizes = [8, 128], strides = [1, 1]} : vector<8x384xf32> to vector<8x128xf32>
    %57 = vector.extract_strided_slice %55 {offsets = [0, 128], sizes = [8, 128], strides = [1, 1]} : vector<8x384xf32> to vector<8x128xf32>
    %58 = vector.extract_strided_slice %55 {offsets = [0, 256], sizes = [8, 128], strides = [1, 1]} : vector<8x384xf32> to vector<8x128xf32>
    %59 = vector.extract_strided_slice %49 {offsets = [0, 384], sizes = [8, 128], strides = [1, 1]} : vector<8x512xf32> to vector<8x128xf32>
    %60 = math.tanh %59 : vector<8x128xf32>
    %61 = arith.mulf %57, %44 : vector<8x128xf32>
    %62 = arith.mulf %56, %60 : vector<8x128xf32>
    %63 = arith.addf %61, %62 : vector<8x128xf32>
    %64 = math.tanh %63 : vector<8x128xf32>
    %65 = arith.mulf %58, %64 : vector<8x128xf32>
    %66 = vector.extract_strided_slice %5 {offsets = [24, 0], sizes = [8, 512], strides = [1, 1]} : vector<64x512xf32> to vector<8x512xf32>
    %cst_15 = arith.constant dense<0.000000e+00> : vector<8x512xf32>
    %67 = tpu.matmul %65, %6, %cst_15 {dimension_numbers = #tpu.dot_dimension_numbers<[1], [0], [0], [1], [0, 0, 1, 1], [], []>} : vector<8x128xf32>, vector<128x512xf32>, vector<8x512xf32> -> vector<8x512xf32>
    %68 = arith.addf %66, %67 : vector<8x512xf32>
    %69 = vector.extract_strided_slice %68 {offsets = [0, 0], sizes = [8, 384], strides = [1, 1]} : vector<8x512xf32> to vector<8x384xf32>
    %70 = arith.negf %69 : vector<8x384xf32>
    %71 = math.exp %70 : vector<8x384xf32>
    %cst_16 = arith.constant 1.000000e+00 : f32
    %72 = vector.broadcast %cst_16 : f32 to vector<8x384xf32>
    %73 = arith.addf %72, %71 : vector<8x384xf32>
    %74 = arith.divf %72, %73 : vector<8x384xf32>
    %75 = vector.extract_strided_slice %74 {offsets = [0, 0], sizes = [8, 128], strides = [1, 1]} : vector<8x384xf32> to vector<8x128xf32>
    %76 = vector.extract_strided_slice %74 {offsets = [0, 128], sizes = [8, 128], strides = [1, 1]} : vector<8x384xf32> to vector<8x128xf32>
    %77 = vector.extract_strided_slice %74 {offsets = [0, 256], sizes = [8, 128], strides = [1, 1]} : vector<8x384xf32> to vector<8x128xf32>
    %78 = vector.extract_strided_slice %68 {offsets = [0, 384], sizes = [8, 128], strides = [1, 1]} : vector<8x512xf32> to vector<8x128xf32>
    %79 = math.tanh %78 : vector<8x128xf32>
    %80 = arith.mulf %76, %63 : vector<8x128xf32>
    %81 = arith.mulf %75, %79 : vector<8x128xf32>
    %82 = arith.addf %80, %81 : vector<8x128xf32>
    %83 = math.tanh %82 : vector<8x128xf32>
    %84 = arith.mulf %77, %83 : vector<8x128xf32>
    %85 = vector.extract_strided_slice %5 {offsets = [32, 0], sizes = [8, 512], strides = [1, 1]} : vector<64x512xf32> to vector<8x512xf32>
    %cst_17 = arith.constant dense<0.000000e+00> : vector<8x512xf32>
    %86 = tpu.matmul %84, %6, %cst_17 {dimension_numbers = #tpu.dot_dimension_numbers<[1], [0], [0], [1], [0, 0, 1, 1], [], []>} : vector<8x128xf32>, vector<128x512xf32>, vector<8x512xf32> -> vector<8x512xf32>
    %87 = arith.addf %85, %86 : vector<8x512xf32>
    %88 = vector.extract_strided_slice %87 {offsets = [0, 0], sizes = [8, 384], strides = [1, 1]} : vector<8x512xf32> to vector<8x384xf32>
    %89 = arith.negf %88 : vector<8x384xf32>
    %90 = math.exp %89 : vector<8x384xf32>
    %cst_18 = arith.constant 1.000000e+00 : f32
    %91 = vector.broadcast %cst_18 : f32 to vector<8x384xf32>
    %92 = arith.addf %91, %90 : vector<8x384xf32>
    %93 = arith.divf %91, %92 : vector<8x384xf32>
    %94 = vector.extract_strided_slice %93 {offsets = [0, 0], sizes = [8, 128], strides = [1, 1]} : vector<8x384xf32> to vector<8x128xf32>
    %95 = vector.extract_strided_slice %93 {offsets = [0, 128], sizes = [8, 128], strides = [1, 1]} : vector<8x384xf32> to vector<8x128xf32>
    %96 = vector.extract_strided_slice %93 {offsets = [0, 256], sizes = [8, 128], strides = [1, 1]} : vector<8x384xf32> to vector<8x128xf32>
    %97 = vector.extract_strided_slice %87 {offsets = [0, 384], sizes = [8, 128], strides = [1, 1]} : vector<8x512xf32> to vector<8x128xf32>
    %98 = math.tanh %97 : vector<8x128xf32>
    %99 = arith.mulf %95, %82 : vector<8x128xf32>
    %100 = arith.mulf %94, %98 : vector<8x128xf32>
    %101 = arith.addf %99, %100 : vector<8x128xf32>
    %102 = math.tanh %101 : vector<8x128xf32>
    %103 = arith.mulf %96, %102 : vector<8x128xf32>
    %104 = vector.extract_strided_slice %5 {offsets = [40, 0], sizes = [8, 512], strides = [1, 1]} : vector<64x512xf32> to vector<8x512xf32>
    %cst_19 = arith.constant dense<0.000000e+00> : vector<8x512xf32>
    %105 = tpu.matmul %103, %6, %cst_19 {dimension_numbers = #tpu.dot_dimension_numbers<[1], [0], [0], [1], [0, 0, 1, 1], [], []>} : vector<8x128xf32>, vector<128x512xf32>, vector<8x512xf32> -> vector<8x512xf32>
    %106 = arith.addf %104, %105 : vector<8x512xf32>
    %107 = vector.extract_strided_slice %106 {offsets = [0, 0], sizes = [8, 384], strides = [1, 1]} : vector<8x512xf32> to vector<8x384xf32>
    %108 = arith.negf %107 : vector<8x384xf32>
    %109 = math.exp %108 : vector<8x384xf32>
    %cst_20 = arith.constant 1.000000e+00 : f32
    %110 = vector.broadcast %cst_20 : f32 to vector<8x384xf32>
    %111 = arith.addf %110, %109 : vector<8x384xf32>
    %112 = arith.divf %110, %111 : vector<8x384xf32>
    %113 = vector.extract_strided_slice %112 {offsets = [0, 0], sizes = [8, 128], strides = [1, 1]} : vector<8x384xf32> to vector<8x128xf32>
    %114 = vector.extract_strided_slice %112 {offsets = [0, 128], sizes = [8, 128], strides = [1, 1]} : vector<8x384xf32> to vector<8x128xf32>
    %115 = vector.extract_strided_slice %112 {offsets = [0, 256], sizes = [8, 128], strides = [1, 1]} : vector<8x384xf32> to vector<8x128xf32>
    %116 = vector.extract_strided_slice %106 {offsets = [0, 384], sizes = [8, 128], strides = [1, 1]} : vector<8x512xf32> to vector<8x128xf32>
    %117 = math.tanh %116 : vector<8x128xf32>
    %118 = arith.mulf %114, %101 : vector<8x128xf32>
    %119 = arith.mulf %113, %117 : vector<8x128xf32>
    %120 = arith.addf %118, %119 : vector<8x128xf32>
    %121 = math.tanh %120 : vector<8x128xf32>
    %122 = arith.mulf %115, %121 : vector<8x128xf32>
    %123 = vector.extract_strided_slice %5 {offsets = [48, 0], sizes = [8, 512], strides = [1, 1]} : vector<64x512xf32> to vector<8x512xf32>
    %cst_21 = arith.constant dense<0.000000e+00> : vector<8x512xf32>
    %124 = tpu.matmul %122, %6, %cst_21 {dimension_numbers = #tpu.dot_dimension_numbers<[1], [0], [0], [1], [0, 0, 1, 1], [], []>} : vector<8x128xf32>, vector<128x512xf32>, vector<8x512xf32> -> vector<8x512xf32>
    %125 = arith.addf %123, %124 : vector<8x512xf32>
    %126 = vector.extract_strided_slice %125 {offsets = [0, 0], sizes = [8, 384], strides = [1, 1]} : vector<8x512xf32> to vector<8x384xf32>
    %127 = arith.negf %126 : vector<8x384xf32>
    %128 = math.exp %127 : vector<8x384xf32>
    %cst_22 = arith.constant 1.000000e+00 : f32
    %129 = vector.broadcast %cst_22 : f32 to vector<8x384xf32>
    %130 = arith.addf %129, %128 : vector<8x384xf32>
    %131 = arith.divf %129, %130 : vector<8x384xf32>
    %132 = vector.extract_strided_slice %131 {offsets = [0, 0], sizes = [8, 128], strides = [1, 1]} : vector<8x384xf32> to vector<8x128xf32>
    %133 = vector.extract_strided_slice %131 {offsets = [0, 128], sizes = [8, 128], strides = [1, 1]} : vector<8x384xf32> to vector<8x128xf32>
    %134 = vector.extract_strided_slice %131 {offsets = [0, 256], sizes = [8, 128], strides = [1, 1]} : vector<8x384xf32> to vector<8x128xf32>
    %135 = vector.extract_strided_slice %125 {offsets = [0, 384], sizes = [8, 128], strides = [1, 1]} : vector<8x512xf32> to vector<8x128xf32>
    %136 = math.tanh %135 : vector<8x128xf32>
    %137 = arith.mulf %133, %120 : vector<8x128xf32>
    %138 = arith.mulf %132, %136 : vector<8x128xf32>
    %139 = arith.addf %137, %138 : vector<8x128xf32>
    %140 = math.tanh %139 : vector<8x128xf32>
    %141 = arith.mulf %134, %140 : vector<8x128xf32>
    %142 = vector.extract_strided_slice %5 {offsets = [56, 0], sizes = [8, 512], strides = [1, 1]} : vector<64x512xf32> to vector<8x512xf32>
    %cst_23 = arith.constant dense<0.000000e+00> : vector<8x512xf32>
    %143 = tpu.matmul %141, %6, %cst_23 {dimension_numbers = #tpu.dot_dimension_numbers<[1], [0], [0], [1], [0, 0, 1, 1], [], []>} : vector<8x128xf32>, vector<128x512xf32>, vector<8x512xf32> -> vector<8x512xf32>
    %144 = arith.addf %142, %143 : vector<8x512xf32>
    %145 = vector.extract_strided_slice %144 {offsets = [0, 0], sizes = [8, 384], strides = [1, 1]} : vector<8x512xf32> to vector<8x384xf32>
    %146 = arith.negf %145 : vector<8x384xf32>
    %147 = math.exp %146 : vector<8x384xf32>
    %cst_24 = arith.constant 1.000000e+00 : f32
    %148 = vector.broadcast %cst_24 : f32 to vector<8x384xf32>
    %149 = arith.addf %148, %147 : vector<8x384xf32>
    %150 = arith.divf %148, %149 : vector<8x384xf32>
    %151 = vector.extract_strided_slice %150 {offsets = [0, 0], sizes = [8, 128], strides = [1, 1]} : vector<8x384xf32> to vector<8x128xf32>
    %152 = vector.extract_strided_slice %150 {offsets = [0, 128], sizes = [8, 128], strides = [1, 1]} : vector<8x384xf32> to vector<8x128xf32>
    %153 = vector.extract_strided_slice %150 {offsets = [0, 256], sizes = [8, 128], strides = [1, 1]} : vector<8x384xf32> to vector<8x128xf32>
    %154 = vector.extract_strided_slice %144 {offsets = [0, 384], sizes = [8, 128], strides = [1, 1]} : vector<8x512xf32> to vector<8x128xf32>
    %155 = math.tanh %154 : vector<8x128xf32>
    %156 = arith.mulf %152, %139 : vector<8x128xf32>
    %157 = arith.mulf %151, %155 : vector<8x128xf32>
    %158 = arith.addf %156, %157 : vector<8x128xf32>
    %159 = math.tanh %158 : vector<8x128xf32>
    %160 = arith.mulf %153, %159 : vector<8x128xf32>
    %c0_25 = arith.constant 0 : index
    %c0_26 = arith.constant 0 : index
    %161 = vector.load %arg4[%c0_25, %c0_26] : memref<8x128xf32, #tpu.memory_space<vmem>>, vector<8x128xf32>
    tpu.vector_store %arg4[%c0_25, %c0_26], %160 {strides = array<i32>} : memref<8x128xf32, #tpu.memory_space<vmem>>, vector<8x128xf32>,
    return
  }
}

</mosaic_0001>

<bundles_post_ra>
// kernel: accumulator_forward.1
= control target key start
LH: loop header
LB: loop body
LE: loop exit
PB: predicated region body
PF: predicated region fallthrough
CT: control target
= control target key end

     0   :  { %s4803_s1 = inlined_call_operand.vmem [shape: f32[512,512], index: 1, kind: input, shape index: {}]   ;;  %s4804_s0 = inlined_call_operand.vmem [shape: f32[64,512], index: 0, kind: input, shape index: {}]   ;;  %s4805_s2 = inlined_call_operand.vmem [shape: f32[128,512], index: 2, kind: input, shape index: {}]   ;;  %s4806_s3 = inlined_call_operand.vmem [shape: f32[1,512], index: 3, kind: input, shape index: {}]   ;;  %s4807_s4 = inlined_call_operand.vmem [shape: f32[8,128], index: 4, kind: output, shape index: {}]  }
   0x1   :  { %v110_v0 = vld [vmem:[%s4803_s1 + $0x1e8] sm:$0xff]  ;;  %v109_v2 = vld [vmem:[%s4803_s1 + $0x1e0] sm:$0xff] }
   0x2   :  { %v238_v1 = vld [vmem:[%s4803_s1 + $0x5e8] sm:$0xff]  ;;  %327 = vmatprep.subr.mxu0 %v110_v0  ;;  %v237_v3 = vld [vmem:[%s4803_s1 + $0x5e0] sm:$0xff] }
   0x3   :  { %440 = vmatprep.subr.mxu1 %v238_v1  ;;  %v106_v4 = vld [vmem:[%s4803_s1 + $0x1c8] sm:$0xff]  ;;  %328 = vmatpush1.msra.mxu0 %v109_v2  ;;  %v105_v6 = vld [vmem:[%s4803_s1 + $0x1c0] sm:$0xff] }
   0x4   :  { %v234_v5 = vld [vmem:[%s4803_s1 + $0x5c8] sm:$0xff]  ;;  %441 = vmatpush1.msra.mxu1 %v237_v3  ;;  %v233_v7 = vld [vmem:[%s4803_s1 + $0x5c0] sm:$0xff]  ;;  %329 = vmatprep.subr.mxu0 %v106_v4 }
   0x5   :  { %v102_v8 = vld [vmem:[%s4803_s1 + $0x1a8] sm:$0xff]  ;;  %442 = vmatprep.subr.mxu1 %v234_v5  ;;  %v101_v10 = vld [vmem:[%s4803_s1 + $0x1a0] sm:$0xff]  ;;  %330 = vmatpush1.msra.mxu0 %v105_v6 }
   0x6   :  { %v230_v9 = vld [vmem:[%s4803_s1 + $0x5a8] sm:$0xff]  ;;  %v229_v11 = vld [vmem:[%s4803_s1 + $0x5a0] sm:$0xff]  ;;  %443 = vmatpush1.msra.mxu1 %v233_v7  ;;  %331 = vmatprep.subr.mxu0 %v102_v8 }
   0x7   :  { %v98_v12 = vld [vmem:[%s4803_s1 + $0x188] sm:$0xff]  ;;  %444 = vmatprep.subr.mxu1 %v230_v9  ;;  %v97_v14 = vld [vmem:[%s4803_s1 + $0x180] sm:$0xff]  ;;  %332 = vmatpush1.msra.mxu0 %v101_v10 }
   0x8   :  { %v226_v13 = vld [vmem:[%s4803_s1 + $0x588] sm:$0xff]  ;;  %v225_v15 = vld [vmem:[%s4803_s1 + $0x580] sm:$0xff]  ;;  %445 = vmatpush1.msra.mxu1 %v229_v11  ;;  %333 = vmatprep.subr.mxu0 %v98_v12 }
   0x9   :  { %v94_v16 = vld [vmem:[%s4803_s1 + $0x168] sm:$0xff]  ;;  %446 = vmatprep.subr.mxu1 %v226_v13  ;;  %v93_v18 = vld [vmem:[%s4803_s1 + $0x160] sm:$0xff]  ;;  %334 = vmatpush1.msra.mxu0 %v97_v14 }
   0xa   :  { %v222_v17 = vld [vmem:[%s4803_s1 + $0x568] sm:$0xff]  ;;  %v221_v19 = vld [vmem:[%s4803_s1 + $0x560] sm:$0xff]  ;;  %447 = vmatpush1.msra.mxu1 %v225_v15  ;;  %335 = vmatprep.subr.mxu0 %v94_v16 }
   0xb   :  { %v90_v20 = vld [vmem:[%s4803_s1 + $0x148] sm:$0xff]  ;;  %448 = vmatprep.subr.mxu1 %v222_v17  ;;  %v89_v22 = vld [vmem:[%s4803_s1 + $0x140] sm:$0xff]  ;;  %336 = vmatpush1.msra.mxu0 %v93_v18 }
   0xc   :  { %v218_v21 = vld [vmem:[%s4803_s1 + $0x548] sm:$0xff]  ;;  %v217_v23 = vld [vmem:[%s4803_s1 + $0x540] sm:$0xff]  ;;  %449 = vmatpush1.msra.mxu1 %v221_v19  ;;  %337 = vmatprep.subr.mxu0 %v90_v20 }
   0xd   :  { %v86_v24 = vld [vmem:[%s4803_s1 + $0x128] sm:$0xff]  ;;  %450 = vmatprep.subr.mxu1 %v218_v21  ;;  %v85_v26 = vld [vmem:[%s4803_s1 + $0x120] sm:$0xff]  ;;  %338 = vmatpush1.msra.mxu0 %v89_v22 }
   0xe   :  { %v214_v25 = vld [vmem:[%s4803_s1 + $0x528] sm:$0xff]  ;;  %v213_v27 = vld [vmem:[%s4803_s1 + $0x520] sm:$0xff]  ;;  %451 = vmatpush1.msra.mxu1 %v217_v23  ;;  %339 = vmatprep.subr.mxu0 %v86_v24 }
   0xf   :  { %v82_v28 = vld [vmem:[%s4803_s1 + $0x108] sm:$0xff]  ;;  %452 = vmatprep.subr.mxu1 %v214_v25  ;;  %v81_v30 = vld [vmem:[%s4803_s1 + $0x100] sm:$0xff]  ;;  %340 = vmatpush1.msra.mxu0 %v85_v26 }
  0x10   :  { %v210_v29 = vld [vmem:[%s4803_s1 + $0x508] sm:$0xff]  ;;  %v209_v31 = vld [vmem:[%s4803_s1 + $0x500] sm:$0xff]  ;;  %453 = vmatpush1.msra.mxu1 %v213_v27  ;;  %341 = vmatprep.subr.mxu0 %v82_v28 }
  0x11   :  { %v78_v32 = vld [vmem:[%s4803_s1 + $0xe8] sm:$0xff]  ;;  %454 = vmatprep.subr.mxu1 %v210_v29  ;;  %v77_v34 = vld [vmem:[%s4803_s1 + $0xe0] sm:$0xff]  ;;  %342 = vmatpush1.msra.mxu0 %v81_v30 }
  0x12   :  { %v206_v33 = vld [vmem:[%s4803_s1 + $0x4e8] sm:$0xff]  ;;  %v205_v35 = vld [vmem:[%s4803_s1 + $0x4e0] sm:$0xff]  ;;  %455 = vmatpush1.msra.mxu1 %v209_v31  ;;  %343 = vmatprep.subr.mxu0 %v78_v32 }
  0x13   :  { %v74_v36 = vld [vmem:[%s4803_s1 + $0xc8] sm:$0xff]  ;;  %456 = vmatprep.subr.mxu1 %v206_v33  ;;  %v73_v38 = vld [vmem:[%s4803_s1 + $0xc0] sm:$0xff]  ;;  %344 = vmatpush1.msra.mxu0 %v77_v34 }
  0x14   :  { %v202_v37 = vld [vmem:[%s4803_s1 + $0x4c8] sm:$0xff]  ;;  %v201_v39 = vld [vmem:[%s4803_s1 + $0x4c0] sm:$0xff]  ;;  %457 = vmatpush1.msra.mxu1 %v205_v35  ;;  %345 = vmatprep.subr.mxu0 %v74_v36 }
  0x15   :  { %v70_v40 = vld [vmem:[%s4803_s1 + $0xa8] sm:$0xff]  ;;  %458 = vmatprep.subr.mxu1 %v202_v37  ;;  %v69_v42 = vld [vmem:[%s4803_s1 + $0xa0] sm:$0xff]  ;;  %346 = vmatpush1.msra.mxu0 %v73_v38 }
  0x16   :  { %v198_v41 = vld [vmem:[%s4803_s1 + $0x4a8] sm:$0xff]  ;;  %v197_v43 = vld [vmem:[%s4803_s1 + $0x4a0] sm:$0xff]  ;;  %459 = vmatpush1.msra.mxu1 %v201_v39  ;;  %347 = vmatprep.subr.mxu0 %v70_v40 }
  0x17   :  { %v66_v44 = vld [vmem:[%s4803_s1 + $0x88] sm:$0xff]  ;;  %460 = vmatprep.subr.mxu1 %v198_v41  ;;  %v65_v46 = vld [vmem:[%s4803_s1 + $0x80] sm:$0xff]  ;;  %348 = vmatpush1.msra.mxu0 %v69_v42 }
  0x18   :  { %v194_v45 = vld [vmem:[%s4803_s1 + $0x488] sm:$0xff]  ;;  %v193_v47 = vld [vmem:[%s4803_s1 + $0x480] sm:$0xff]  ;;  %461 = vmatpush1.msra.mxu1 %v197_v43  ;;  %349 = vmatprep.subr.mxu0 %v66_v44 }
  0x19   :  { %v62_v48 = vld [vmem:[%s4803_s1 + $0x68] sm:$0xff]  ;;  %462 = vmatprep.subr.mxu1 %v194_v45  ;;  %v61_v50 = vld [vmem:[%s4803_s1 + $0x60] sm:$0xff]  ;;  %350 = vmatpush1.msra.mxu0 %v65_v46 }
  0x1a   :  { %v190_v49 = vld [vmem:[%s4803_s1 + $0x468] sm:$0xff]  ;;  %v189_v51 = vld [vmem:[%s4803_s1 + $0x460] sm:$0xff]  ;;  %463 = vmatpush1.msra.mxu1 %v193_v47  ;;  %351 = vmatprep.subr.mxu0 %v62_v48 }
  0x1b   :  { %v58_v52 = vld [vmem:[%s4803_s1 + $0x48] sm:$0xff]  ;;  %464 = vmatprep.subr.mxu1 %v190_v49  ;;  %v57_v54 = vld [vmem:[%s4803_s1 + $0x40] sm:$0xff]  ;;  %352 = vmatpush1.msra.mxu0 %v61_v50 }
  0x1c   :  { %v186_v53 = vld [vmem:[%s4803_s1 + $0x448] sm:$0xff]  ;;  %v185_v55 = vld [vmem:[%s4803_s1 + $0x440] sm:$0xff]  ;;  %465 = vmatpush1.msra.mxu1 %v189_v51  ;;  %353 = vmatprep.subr.mxu0 %v58_v52 }
  0x1d   :  { %v54_v56 = vld [vmem:[%s4803_s1 + $0x28] sm:$0xff]  ;;  %466 = vmatprep.subr.mxu1 %v186_v53  ;;  %v53_v58 = vld [vmem:[%s4803_s1 + $0x20] sm:$0xff]  ;;  %354 = vmatpush1.msra.mxu0 %v57_v54 }
  0x1e   :  { %v182_v57 = vld [vmem:[%s4803_s1 + $0x428] sm:$0xff]  ;;  %v181_v59 = vld [vmem:[%s4803_s1 + $0x420] sm:$0xff]  ;;  %467 = vmatpush1.msra.mxu1 %v185_v55  ;;  %355 = vmatprep.subr.mxu0 %v54_v56 }
  0x1f   :  { %v50_v60 = vld [vmem:[%s4803_s1 + $0x8] sm:$0xff]  ;;  %468 = vmatprep.subr.mxu1 %v182_v57  ;;  %v49_v62 = vld [vmem:[%s4803_s1] sm:$0xff]  ;;  %356 = vmatpush1.msra.mxu0 %v53_v58 }
  0x20   :  { %v178_v61 = vld [vmem:[%s4803_s1 + $0x408] sm:$0xff]  ;;  %v177_v63 = vld [vmem:[%s4803_s1 + $0x400] sm:$0xff]  ;;  %469 = vmatpush1.msra.mxu1 %v181_v59  ;;  %357 = vmatprep.subr.mxu0 %v50_v60 }
  0x21   :  { %v174_v0 = vld [vmem:[%s4803_s1 + $0x3e8] sm:$0xff]  ;;  %470 = vmatprep.subr.mxu1 %v178_v61  ;;  %v173_v2 = vld [vmem:[%s4803_s1 + $0x3e0] sm:$0xff]  ;;  %358 = vmatpush1.msra.mxu0 %v49_v62 }
  0x22   :  { %v302_v1 = vld [vmem:[%s4803_s1 + $0x7e8] sm:$0xff]  ;;  %v301_v3 = vld [vmem:[%s4803_s1 + $0x7e0] sm:$0xff]  ;;  %471 = vmatpush1.msra.mxu1 %v177_v63  ;;  %359 = vmatprep.subr.mxu0 %v174_v0 }
  0x23   :  { %v170_v4 = vld [vmem:[%s4803_s1 + $0x3c8] sm:$0xff]  ;;  %472 = vmatprep.subr.mxu1 %v302_v1  ;;  %v169_v6 = vld [vmem:[%s4803_s1 + $0x3c0] sm:$0xff]  ;;  %360 = vmatpush2.msra.mxu0 %v173_v2  ;;  %v2848_v2 = vld [vmem:[%s4804_s0 + $0x18] sm:$0xff] }
  0x24   :  { %v298_v5 = vld [vmem:[%s4803_s1 + $0x7c8] sm:$0xff]  ;;  %v297_v7 = vld [vmem:[%s4803_s1 + $0x7c0] sm:$0xff]  ;;  %473 = vmatpush2.msra.mxu1 %v301_v3  ;;  %361 = vmatprep.subr.mxu0 %v170_v4  ;;  %v112_v3 = vld [vmem:[%s4803_s1 + $0x1f8] sm:$0xff] }
  0x25   :  { %v166_v8 = vld [vmem:[%s4803_s1 + $0x3a8] sm:$0xff]  ;;  %474 = vmatprep.subr.mxu1 %v298_v5  ;;  %v165_v10 = vld [vmem:[%s4803_s1 + $0x3a0] sm:$0xff]  ;;  %362 = vmatpush2.msra.mxu0 %v169_v6  ;;  %v240_v4 = vld [vmem:[%s4803_s1 + $0x5f8] sm:$0xff] }
  0x26   :  { %v294_v9 = vld [vmem:[%s4803_s1 + $0x7a8] sm:$0xff]  ;;  %v293_v11 = vld [vmem:[%s4803_s1 + $0x7a0] sm:$0xff]  ;;  %475 = vmatpush2.msra.mxu1 %v297_v7  ;;  %363 = vmatprep.subr.mxu0 %v166_v8  ;;  %v2860_v5 = vld [vmem:[%s4804_s0 + $0x10] sm:$0xff] }
  0x27   :  { %v162_v12 = vld [vmem:[%s4803_s1 + $0x388] sm:$0xff]  ;;  %476 = vmatprep.subr.mxu1 %v294_v9  ;;  %v161_v14 = vld [vmem:[%s4803_s1 + $0x380] sm:$0xff]  ;;  %364 = vmatpush2.msra.mxu0 %v165_v10  ;;  %v111_v6 = vld [vmem:[%s4803_s1 + $0x1f0] sm:$0xff] }
  0x28   :  { %v290_v13 = vld [vmem:[%s4803_s1 + $0x788] sm:$0xff]  ;;  %v289_v15 = vld [vmem:[%s4803_s1 + $0x780] sm:$0xff]  ;;  %477 = vmatpush2.msra.mxu1 %v293_v11  ;;  %365 = vmatprep.subr.mxu0 %v162_v12  ;;  %v239_v7 = vld [vmem:[%s4803_s1 + $0x5f0] sm:$0xff] }
  0x29   :  { %v158_v16 = vld [vmem:[%s4803_s1 + $0x368] sm:$0xff]  ;;  %478 = vmatprep.subr.mxu1 %v290_v13  ;;  %v157_v18 = vld [vmem:[%s4803_s1 + $0x360] sm:$0xff]  ;;  %366 = vmatpush2.msra.mxu0 %v161_v14  ;;  %v108_v8 = vld [vmem:[%s4803_s1 + $0x1d8] sm:$0xff] }
  0x2a   :  { %v286_v17 = vld [vmem:[%s4803_s1 + $0x768] sm:$0xff]  ;;  %v285_v19 = vld [vmem:[%s4803_s1 + $0x760] sm:$0xff]  ;;  %479 = vmatpush2.msra.mxu1 %v289_v15  ;;  %367 = vmatprep.subr.mxu0 %v158_v16  ;;  %v236_v9 = vld [vmem:[%s4803_s1 + $0x5d8] sm:$0xff] }
  0x2b   :  { %v154_v20 = vld [vmem:[%s4803_s1 + $0x348] sm:$0xff]  ;;  %480 = vmatprep.subr.mxu1 %v286_v17  ;;  %v153_v22 = vld [vmem:[%s4803_s1 + $0x340] sm:$0xff]  ;;  %368 = vmatpush2.msra.mxu0 %v157_v18  ;;  %v107_v10 = vld [vmem:[%s4803_s1 + $0x1d0] sm:$0xff] }
  0x2c   :  { %v282_v21 = vld [vmem:[%s4803_s1 + $0x748] sm:$0xff]  ;;  %v281_v23 = vld [vmem:[%s4803_s1 + $0x740] sm:$0xff]  ;;  %481 = vmatpush2.msra.mxu1 %v285_v19  ;;  %369 = vmatprep.subr.mxu0 %v154_v20  ;;  %v235_v11 = vld [vmem:[%s4803_s1 + $0x5d0] sm:$0xff] }
  0x2d   :  { %v150_v24 = vld [vmem:[%s4803_s1 + $0x328] sm:$0xff]  ;;  %482 = vmatprep.subr.mxu1 %v282_v21  ;;  %v149_v26 = vld [vmem:[%s4803_s1 + $0x320] sm:$0xff]  ;;  %370 = vmatpush2.msra.mxu0 %v153_v22  ;;  %v104_v12 = vld [vmem:[%s4803_s1 + $0x1b8] sm:$0xff] }
  0x2e   :  { %v278_v25 = vld [vmem:[%s4803_s1 + $0x728] sm:$0xff]  ;;  %v277_v27 = vld [vmem:[%s4803_s1 + $0x720] sm:$0xff]  ;;  %483 = vmatpush2.msra.mxu1 %v281_v23  ;;  %371 = vmatprep.subr.mxu0 %v150_v24  ;;  %v232_v13 = vld [vmem:[%s4803_s1 + $0x5b8] sm:$0xff] }
  0x2f   :  { %v146_v28 = vld [vmem:[%s4803_s1 + $0x308] sm:$0xff]  ;;  %484 = vmatprep.subr.mxu1 %v278_v25  ;;  %v145_v30 = vld [vmem:[%s4803_s1 + $0x300] sm:$0xff]  ;;  %372 = vmatpush2.msra.mxu0 %v149_v26  ;;  %v103_v14 = vld [vmem:[%s4803_s1 + $0x1b0] sm:$0xff] }
  0x30   :  { %v274_v29 = vld [vmem:[%s4803_s1 + $0x708] sm:$0xff]  ;;  %v273_v31 = vld [vmem:[%s4803_s1 + $0x700] sm:$0xff]  ;;  %485 = vmatpush2.msra.mxu1 %v277_v27  ;;  %373 = vmatprep.subr.mxu0 %v146_v28  ;;  %v231_v15 = vld [vmem:[%s4803_s1 + $0x5b0] sm:$0xff] }
  0x31   :  { %v142_v32 = vld [vmem:[%s4803_s1 + $0x2e8] sm:$0xff]  ;;  %486 = vmatprep.subr.mxu1 %v274_v29  ;;  %v141_v34 = vld [vmem:[%s4803_s1 + $0x2e0] sm:$0xff]  ;;  %374 = vmatpush2.msra.mxu0 %v145_v30  ;;  %v100_v16 = vld [vmem:[%s4803_s1 + $0x198] sm:$0xff] }
  0x32   :  { %v270_v33 = vld [vmem:[%s4803_s1 + $0x6e8] sm:$0xff]  ;;  %v269_v35 = vld [vmem:[%s4803_s1 + $0x6e0] sm:$0xff]  ;;  %487 = vmatpush2.msra.mxu1 %v273_v31  ;;  %375 = vmatprep.subr.mxu0 %v142_v32  ;;  %v228_v17 = vld [vmem:[%s4803_s1 + $0x598] sm:$0xff] }
  0x33   :  { %v138_v36 = vld [vmem:[%s4803_s1 + $0x2c8] sm:$0xff]  ;;  %488 = vmatprep.subr.mxu1 %v270_v33  ;;  %v137_v38 = vld [vmem:[%s4803_s1 + $0x2c0] sm:$0xff]  ;;  %376 = vmatpush2.msra.mxu0 %v141_v34  ;;  %v99_v18 = vld [vmem:[%s4803_s1 + $0x190] sm:$0xff] }
  0x34   :  { %v266_v37 = vld [vmem:[%s4803_s1 + $0x6c8] sm:$0xff]  ;;  %v265_v39 = vld [vmem:[%s4803_s1 + $0x6c0] sm:$0xff]  ;;  %489 = vmatpush2.msra.mxu1 %v269_v35  ;;  %377 = vmatprep.subr.mxu0 %v138_v36  ;;  %v227_v19 = vld [vmem:[%s4803_s1 + $0x590] sm:$0xff] }
  0x35   :  { %v134_v40 = vld [vmem:[%s4803_s1 + $0x2a8] sm:$0xff]  ;;  %490 = vmatprep.subr.mxu1 %v266_v37  ;;  %v133_v42 = vld [vmem:[%s4803_s1 + $0x2a0] sm:$0xff]  ;;  %378 = vmatpush2.msra.mxu0 %v137_v38  ;;  %v96_v20 = vld [vmem:[%s4803_s1 + $0x178] sm:$0xff] }
  0x36   :  { %v262_v41 = vld [vmem:[%s4803_s1 + $0x6a8] sm:$0xff]  ;;  %v261_v43 = vld [vmem:[%s4803_s1 + $0x6a0] sm:$0xff]  ;;  %491 = vmatpush2.msra.mxu1 %v265_v39  ;;  %379 = vmatprep.subr.mxu0 %v134_v40  ;;  %v224_v21 = vld [vmem:[%s4803_s1 + $0x578] sm:$0xff] }
  0x37   :  { %v130_v44 = vld [vmem:[%s4803_s1 + $0x288] sm:$0xff]  ;;  %492 = vmatprep.subr.mxu1 %v262_v41  ;;  %v129_v46 = vld [vmem:[%s4803_s1 + $0x280] sm:$0xff]  ;;  %380 = vmatpush2.msra.mxu0 %v133_v42  ;;  %v95_v22 = vld [vmem:[%s4803_s1 + $0x170] sm:$0xff] }
  0x38   :  { %v258_v45 = vld [vmem:[%s4803_s1 + $0x688] sm:$0xff]  ;;  %v257_v47 = vld [vmem:[%s4803_s1 + $0x680] sm:$0xff]  ;;  %493 = vmatpush2.msra.mxu1 %v261_v43  ;;  %381 = vmatprep.subr.mxu0 %v130_v44  ;;  %v223_v23 = vld [vmem:[%s4803_s1 + $0x570] sm:$0xff] }
  0x39   :  { %v126_v48 = vld [vmem:[%s4803_s1 + $0x268] sm:$0xff]  ;;  %494 = vmatprep.subr.mxu1 %v258_v45  ;;  %v125_v50 = vld [vmem:[%s4803_s1 + $0x260] sm:$0xff]  ;;  %382 = vmatpush2.msra.mxu0 %v129_v46  ;;  %v92_v24 = vld [vmem:[%s4803_s1 + $0x158] sm:$0xff] }
  0x3a   :  { %v254_v49 = vld [vmem:[%s4803_s1 + $0x668] sm:$0xff]  ;;  %v253_v51 = vld [vmem:[%s4803_s1 + $0x660] sm:$0xff]  ;;  %495 = vmatpush2.msra.mxu1 %v257_v47  ;;  %383 = vmatprep.subr.mxu0 %v126_v48  ;;  %v220_v25 = vld [vmem:[%s4803_s1 + $0x558] sm:$0xff] }
  0x3b   :  { %v122_v52 = vld [vmem:[%s4803_s1 + $0x248] sm:$0xff]  ;;  %496 = vmatprep.subr.mxu1 %v254_v49  ;;  %v121_v54 = vld [vmem:[%s4803_s1 + $0x240] sm:$0xff]  ;;  %384 = vmatpush2.msra.mxu0 %v125_v50  ;;  %v91_v26 = vld [vmem:[%s4803_s1 + $0x150] sm:$0xff] }
  0x3c   :  { %v250_v53 = vld [vmem:[%s4803_s1 + $0x648] sm:$0xff]  ;;  %v249_v55 = vld [vmem:[%s4803_s1 + $0x640] sm:$0xff]  ;;  %497 = vmatpush2.msra.mxu1 %v253_v51  ;;  %385 = vmatprep.subr.mxu0 %v122_v52  ;;  %v219_v27 = vld [vmem:[%s4803_s1 + $0x550] sm:$0xff] }
  0x3d   :  { %v118_v56 = vld [vmem:[%s4803_s1 + $0x228] sm:$0xff]  ;;  %498 = vmatprep.subr.mxu1 %v250_v53  ;;  %v117_v58 = vld [vmem:[%s4803_s1 + $0x220] sm:$0xff]  ;;  %386 = vmatpush2.msra.mxu0 %v121_v54  ;;  %v88_v28 = vld [vmem:[%s4803_s1 + $0x138] sm:$0xff] }
  0x3e   :  { %v246_v57 = vld [vmem:[%s4803_s1 + $0x628] sm:$0xff]  ;;  %v245_v59 = vld [vmem:[%s4803_s1 + $0x620] sm:$0xff]  ;;  %499 = vmatpush2.msra.mxu1 %v249_v55  ;;  %387 = vmatprep.subr.mxu0 %v118_v56  ;;  %v216_v29 = vld [vmem:[%s4803_s1 + $0x538] sm:$0xff] }
  0x3f   :  { %v114_v60 = vld [vmem:[%s4803_s1 + $0x208] sm:$0xff]  ;;  %500 = vmatprep.subr.mxu1 %v246_v57  ;;  %v113_v62 = vld [vmem:[%s4803_s1 + $0x200] sm:$0xff]  ;;  %388 = vmatpush2.msra.mxu0 %v117_v58  ;;  %v87_v30 = vld [vmem:[%s4803_s1 + $0x130] sm:$0xff] }
  0x40   :  { %v242_v61 = vld [vmem:[%s4803_s1 + $0x608] sm:$0xff]  ;;  %501 = vmatpush2.msra.mxu1 %v245_v59  ;;  %v241_v0 = vld [vmem:[%s4803_s1 + $0x600] sm:$0xff]  ;;  %389 = vmatprep.subr.mxu0 %v114_v60  ;;  %v215_v31 = vld [vmem:[%s4803_s1 + $0x530] sm:$0xff] }
  0x41   :  { %v2835_v63 = vld [vmem:[%s4804_s0 + $0x8] sm:$0xff]  ;;  %v2843_v1 = vld [vmem:[%s4804_s0] sm:$0xff]  ;;  %502 = vmatprep.subr.mxu1 %v242_v61  ;;  %390 = vmatpush2.msra.mxu0 %v113_v62  ;;  %v84_v32 = vld [vmem:[%s4803_s1 + $0x118] sm:$0xff] }
  0x42   :  { %391 = vmatprep.mubr.f32.mxu0 %v2835_v63  ;;  %503 = vmatpush2.msra.mxu1 %v241_v0  ;;  %v212_v33 = vld [vmem:[%s4803_s1 + $0x518] sm:$0xff]  ;;  %v83_v34 = vld [vmem:[%s4803_s1 + $0x110] sm:$0xff] }
  0x43   :  { %392 = vmatmul.mubr.f32.vlgmr.msra.gmra.mxu0 %v2843_v1  ;;  %504 = vmatprep.mubr.f32.mxu1 %v2848_v2  ;;  %v211_v35 = vld [vmem:[%s4803_s1 + $0x510] sm:$0xff]  ;;  %v80_v36 = vld [vmem:[%s4803_s1 + $0xf8] sm:$0xff] }
  0x44   :  { %553 = vmatprep.subr.mxu0 %v112_v3  ;;  %666 = vmatprep.subr.mxu1 %v240_v4  ;;  %v208_v37 = vld [vmem:[%s4803_s1 + $0x4f8] sm:$0xff]  ;;  %v79_v38 = vld [vmem:[%s4803_s1 + $0xf0] sm:$0xff] }
  0x45   :  { %505 = vmatmul.mubr.f32.vlgmr.msra.gmra.mxu1 %v2860_v5  ;;  %554 = vmatpush1.msra.mxu0 %v111_v6  ;;  %v207_v39 = vld [vmem:[%s4803_s1 + $0x4f0] sm:$0xff]  ;;  %v76_v40 = vld [vmem:[%s4803_s1 + $0xd8] sm:$0xff] }
  0x46   :  { %667 = vmatpush1.msra.mxu1 %v239_v7  ;;  %555 = vmatprep.subr.mxu0 %v108_v8  ;;  %v204_v41 = vld [vmem:[%s4803_s1 + $0x4d8] sm:$0xff]  ;;  %v75_v42 = vld [vmem:[%s4803_s1 + $0xd0] sm:$0xff] }
  0x47   :  { %668 = vmatprep.subr.mxu1 %v236_v9  ;;  %556 = vmatpush1.msra.mxu0 %v107_v10  ;;  %v203_v43 = vld [vmem:[%s4803_s1 + $0x4d0] sm:$0xff]  ;;  %v72_v44 = vld [vmem:[%s4803_s1 + $0xb8] sm:$0xff] }
  0x48   :  { %669 = vmatpush1.msra.mxu1 %v235_v11  ;;  %557 = vmatprep.subr.mxu0 %v104_v12  ;;  %v200_v45 = vld [vmem:[%s4803_s1 + $0x4b8] sm:$0xff]  ;;  %v71_v46 = vld [vmem:[%s4803_s1 + $0xb0] sm:$0xff]  ;;  %v3066_v12 = vld [vmem:[%s4804_s0 + $0x28] sm:$0xff] }
  0x49   :  { %670 = vmatprep.subr.mxu1 %v232_v13  ;;  %558 = vmatpush1.msra.mxu0 %v103_v14  ;;  %v199_v47 = vld [vmem:[%s4803_s1 + $0x4b0] sm:$0xff]  ;;  %v68_v48 = vld [vmem:[%s4803_s1 + $0x98] sm:$0xff] }
  0x4a   :  { %671 = vmatpush1.msra.mxu1 %v231_v15  ;;  %559 = vmatprep.subr.mxu0 %v100_v16  ;;  %v196_v49 = vld [vmem:[%s4803_s1 + $0x498] sm:$0xff]  ;;  %v67_v50 = vld [vmem:[%s4803_s1 + $0x90] sm:$0xff]  ;;  %v3077_v15 = vld [vmem:[%s4804_s0 + $0x20] sm:$0xff] }
  0x4b   :  { %672 = vmatprep.subr.mxu1 %v228_v17  ;;  %560 = vmatpush1.msra.mxu0 %v99_v18  ;;  %v195_v51 = vld [vmem:[%s4803_s1 + $0x490] sm:$0xff]  ;;  %v64_v52 = vld [vmem:[%s4803_s1 + $0x78] sm:$0xff] }
  0x4c   :  { %673 = vmatpush1.msra.mxu1 %v227_v19  ;;  %561 = vmatprep.subr.mxu0 %v96_v20  ;;  %v192_v53 = vld [vmem:[%s4803_s1 + $0x478] sm:$0xff]  ;;  %v63_v54 = vld [vmem:[%s4803_s1 + $0x70] sm:$0xff] }
  0x4d   :  { %674 = vmatprep.subr.mxu1 %v224_v21  ;;  %562 = vmatpush1.msra.mxu0 %v95_v22  ;;  %v191_v55 = vld [vmem:[%s4803_s1 + $0x470] sm:$0xff]  ;;  %v60_v56 = vld [vmem:[%s4803_s1 + $0x58] sm:$0xff] }
  0x4e   :  { %675 = vmatpush1.msra.mxu1 %v223_v23  ;;  %563 = vmatprep.subr.mxu0 %v92_v24  ;;  %v188_v57 = vld [vmem:[%s4803_s1 + $0x458] sm:$0xff]  ;;  %v59_v58 = vld [vmem:[%s4803_s1 + $0x50] sm:$0xff]  ;;  %v3113_v24 = vld [vmem:[%s4804_s0 + $0x48] sm:$0xff] }
  0x4f   :  { %676 = vmatprep.subr.mxu1 %v220_v25  ;;  %564 = vmatpush1.msra.mxu0 %v91_v26  ;;  %v187_v59 = vld [vmem:[%s4803_s1 + $0x450] sm:$0xff]  ;;  %v56_v60 = vld [vmem:[%s4803_s1 + $0x38] sm:$0xff] }
  0x50   :  { %677 = vmatpush1.msra.mxu1 %v219_v27  ;;  %565 = vmatprep.subr.mxu0 %v88_v28  ;;  %v184_v61 = vld [vmem:[%s4803_s1 + $0x438] sm:$0xff]  ;;  %v55_v62 = vld [vmem:[%s4803_s1 + $0x30] sm:$0xff]  ;;  %v3125_v27 = vld [vmem:[%s4804_s0 + $0x40] sm:$0xff] }
  0x51   :  { %678 = vmatprep.subr.mxu1 %v216_v29  ;;  %566 = vmatpush1.msra.mxu0 %v87_v30  ;;  %v183_v0 = vld [vmem:[%s4803_s1 + $0x430] sm:$0xff]  ;;  %v52_v3 = vld [vmem:[%s4803_s1 + $0x18] sm:$0xff] }
  0x52   :  { %679 = vmatpush1.msra.mxu1 %v215_v31  ;;  %567 = vmatprep.subr.mxu0 %v84_v32  ;;  %v180_v4 = vld [vmem:[%s4803_s1 + $0x418] sm:$0xff]  ;;  %v51_v6 = vld [vmem:[%s4803_s1 + $0x10] sm:$0xff] }
  0x53   :  { %680 = vmatprep.subr.mxu1 %v212_v33  ;;  %568 = vmatpush1.msra.mxu0 %v83_v34  ;;  %v179_v7 = vld [vmem:[%s4803_s1 + $0x410] sm:$0xff]  ;;  %v176_v8 = vld [vmem:[%s4803_s1 + $0x3f8] sm:$0xff] }
  0x54   :  { %681 = vmatpush1.msra.mxu1 %v211_v35  ;;  %569 = vmatprep.subr.mxu0 %v80_v36  ;;  %v304_v9 = vld [vmem:[%s4803_s1 + $0x7f8] sm:$0xff]  ;;  %v175_v10 = vld [vmem:[%s4803_s1 + $0x3f0] sm:$0xff]  ;;  %v3161_v36 = vld [vmem:[%s4804_s0 + $0x68] sm:$0xff] }
  0x55   :  { %682 = vmatprep.subr.mxu1 %v208_v37  ;;  %570 = vmatpush1.msra.mxu0 %v79_v38  ;;  %v303_v11 = vld [vmem:[%s4803_s1 + $0x7f0] sm:$0xff]  ;;  %v172_v13 = vld [vmem:[%s4803_s1 + $0x3d8] sm:$0xff] }
  0x56   :  { %683 = vmatpush1.msra.mxu1 %v207_v39  ;;  %571 = vmatprep.subr.mxu0 %v76_v40  ;;  %v300_v14 = vld [vmem:[%s4803_s1 + $0x7d8] sm:$0xff]  ;;  %v171_v17 = vld [vmem:[%s4803_s1 + $0x3d0] sm:$0xff]  ;;  %v3173_v39 = vld [vmem:[%s4804_s0 + $0x60] sm:$0xff] }
  0x57   :  { %684 = vmatprep.subr.mxu1 %v204_v41  ;;  %572 = vmatpush1.msra.mxu0 %v75_v42  ;;  %v3082_v16 = vld [vmem:[%s4804_s0 + $0x38] sm:$0xff]  ;;  %v299_v18 = vld [vmem:[%s4803_s1 + $0x7d0] sm:$0xff] }
  0x58   :  { %685 = vmatpush1.msra.mxu1 %v203_v43  ;;  %573 = vmatprep.subr.mxu0 %v72_v44  ;;  %v168_v19 = vld [vmem:[%s4803_s1 + $0x3b8] sm:$0xff]  ;;  %v3098_v20 = vld [vmem:[%s4804_s0 + $0x30] sm:$0xff] }
  0x59   :  { %686 = vmatprep.subr.mxu1 %v200_v45  ;;  %574 = vmatpush1.msra.mxu0 %v71_v46  ;;  %v296_v21 = vld [vmem:[%s4803_s1 + $0x7b8] sm:$0xff]  ;;  %v167_v22 = vld [vmem:[%s4803_s1 + $0x3b0] sm:$0xff] }
  0x5a   :  { %687 = vmatpush1.msra.mxu1 %v199_v47  ;;  %575 = vmatprep.subr.mxu0 %v68_v48  ;;  %v295_v23 = vld [vmem:[%s4803_s1 + $0x7b0] sm:$0xff]  ;;  %v164_v25 = vld [vmem:[%s4803_s1 + $0x398] sm:$0xff]  ;;  %v3209_v48 = vld [vmem:[%s4804_s0 + $0x88] sm:$0xff] }
  0x5b   :  { %688 = vmatprep.subr.mxu1 %v196_v49  ;;  %576 = vmatpush1.msra.mxu0 %v67_v50  ;;  %v292_v26 = vld [vmem:[%s4803_s1 + $0x798] sm:$0xff]  ;;  %v163_v29 = vld [vmem:[%s4803_s1 + $0x390] sm:$0xff] }
  0x5c   :  { %689 = vmatpush1.msra.mxu1 %v195_v51  ;;  %577 = vmatprep.subr.mxu0 %v64_v52  ;;  %v3130_v28 = vld [vmem:[%s4804_s0 + $0x58] sm:$0xff]  ;;  %v291_v30 = vld [vmem:[%s4803_s1 + $0x790] sm:$0xff]  ;;  %v3221_v51 = vld [vmem:[%s4804_s0 + $0x80] sm:$0xff] }
  0x5d   :  { %690 = vmatprep.subr.mxu1 %v192_v53  ;;  %578 = vmatpush1.msra.mxu0 %v63_v54  ;;  %v160_v31 = vld [vmem:[%s4803_s1 + $0x378] sm:$0xff]  ;;  %v3146_v32 = vld [vmem:[%s4804_s0 + $0x50] sm:$0xff] }
  0x5e   :  { %691 = vmatpush1.msra.mxu1 %v191_v55  ;;  %579 = vmatprep.subr.mxu0 %v60_v56  ;;  %v288_v33 = vld [vmem:[%s4803_s1 + $0x778] sm:$0xff]  ;;  %v159_v34 = vld [vmem:[%s4803_s1 + $0x370] sm:$0xff] }
  0x5f   :  { %692 = vmatprep.subr.mxu1 %v188_v57  ;;  %580 = vmatpush1.msra.mxu0 %v59_v58  ;;  %v287_v35 = vld [vmem:[%s4803_s1 + $0x770] sm:$0xff]  ;;  %v156_v37 = vld [vmem:[%s4803_s1 + $0x358] sm:$0xff] }
  0x60   :  { %693 = vmatpush1.msra.mxu1 %v187_v59  ;;  %581 = vmatprep.subr.mxu0 %v56_v60  ;;  %v284_v38 = vld [vmem:[%s4803_s1 + $0x758] sm:$0xff]  ;;  %v155_v41 = vld [vmem:[%s4803_s1 + $0x350] sm:$0xff]  ;;  %v3257_v60 = vld [vmem:[%s4804_s0 + $0xa8] sm:$0xff] }
  0x61   :  { %694 = vmatprep.subr.mxu1 %v184_v61  ;;  %582 = vmatpush1.msra.mxu0 %v55_v62  ;;  %v3178_v40 = vld [vmem:[%s4804_s0 + $0x78] sm:$0xff]  ;;  %v283_v42 = vld [vmem:[%s4803_s1 + $0x750] sm:$0xff] }
  0x62   :  { %695 = vmatpush1.msra.mxu1 %v183_v0  ;;  %583 = vmatprep.subr.mxu0 %v52_v3  ;;  %v152_v43 = vld [vmem:[%s4803_s1 + $0x338] sm:$0xff]  ;;  %v3194_v44 = vld [vmem:[%s4804_s0 + $0x70] sm:$0xff]  ;;  %v3269_v0 = vld [vmem:[%s4804_s0 + $0xa0] sm:$0xff] }
  0x63   :  { %696 = vmatprep.subr.mxu1 %v180_v4  ;;  %584 = vmatpush1.msra.mxu0 %v51_v6  ;;  %v280_v45 = vld [vmem:[%s4803_s1 + $0x738] sm:$0xff]  ;;  %v151_v46 = vld [vmem:[%s4803_s1 + $0x330] sm:$0xff] }
  0x64   :  { %697 = vmatpush1.msra.mxu1 %v179_v7  ;;  %585 = vmatprep.subr.mxu0 %v176_v8  ;;  %v279_v47 = vld [vmem:[%s4803_s1 + $0x730] sm:$0xff]  ;;  %v148_v49 = vld [vmem:[%s4803_s1 + $0x318] sm:$0xff] }
  0x65   :  { %698 = vmatprep.subr.mxu1 %v304_v9  ;;  %586 = vmatpush2.msra.mxu0 %v175_v10  ;;  %v276_v50 = vld [vmem:[%s4803_s1 + $0x718] sm:$0xff]  ;;  %v147_v53 = vld [vmem:[%s4803_s1 + $0x310] sm:$0xff] }
  0x66   :  { %699 = vmatpush2.msra.mxu1 %v303_v11  ;;  %397 = vmatprep.mubr.f32.mxu0 %v3066_v12  ;;  %v3226_v52 = vld [vmem:[%s4804_s0 + $0x98] sm:$0xff]  ;;  %v275_v54 = vld [vmem:[%s4803_s1 + $0x710] sm:$0xff] }
  0x67   :  { %587 = vmatprep.subr.mxu0 %v172_v13  ;;  %700 = vmatprep.subr.mxu1 %v300_v14  ;;  %v144_v55 = vld [vmem:[%s4803_s1 + $0x2f8] sm:$0xff]  ;;  %v3242_v56 = vld [vmem:[%s4804_s0 + $0x90] sm:$0xff]  ;;  %v3305_v13 = vld [vmem:[%s4804_s0 + $0xc8] sm:$0xff] }
  0x68   :  { %398 = vmatmul.mubr.f32.gmra.mxu0 %v3077_v15  ;;  %510 = vmatprep.mubr.f32.mxu1 %v3082_v16  ;;  %v272_v57 = vld [vmem:[%s4803_s1 + $0x6f8] sm:$0xff]  ;;  %v143_v58 = vld [vmem:[%s4803_s1 + $0x2f0] sm:$0xff] }
  0x69   :  { %588 = vmatpush2.msra.mxu0 %v171_v17  ;;  %701 = vmatpush2.msra.mxu1 %v299_v18  ;;  %v271_v59 = vld [vmem:[%s4803_s1 + $0x6f0] sm:$0xff]  ;;  %v140_v61 = vld [vmem:[%s4803_s1 + $0x2d8] sm:$0xff]  ;;  %v3317_v18 = vld [vmem:[%s4804_s0 + $0xc0] sm:$0xff] }
  0x6a   :  { %589 = vmatprep.subr.mxu0 %v168_v19  ;;  %511 = vmatmul.mubr.f32.gmra.mxu1 %v3098_v20  ;;  %v268_v62 = vld [vmem:[%s4803_s1 + $0x6d8] sm:$0xff]  ;;  %v139_v4 = vld [vmem:[%s4803_s1 + $0x2d0] sm:$0xff] }
  0x6b   :  { %702 = vmatprep.subr.mxu1 %v296_v21  ;;  %590 = vmatpush2.msra.mxu0 %v167_v22  ;;  %v3274_v3 = vld [vmem:[%s4804_s0 + $0xb8] sm:$0xff]  ;;  %v267_v6 = vld [vmem:[%s4803_s1 + $0x6d0] sm:$0xff] }
  0x6c   :  { %703 = vmatpush2.msra.mxu1 %v295_v23  ;;  %403 = vmatprep.mubr.f32.mxu0 %v3113_v24  ;;  %v136_v7 = vld [vmem:[%s4803_s1 + $0x2b8] sm:$0xff]  ;;  %v3290_v8 = vld [vmem:[%s4804_s0 + $0xb0] sm:$0xff] }
  0x6d   :  { %591 = vmatprep.subr.mxu0 %v164_v25  ;;  %704 = vmatprep.subr.mxu1 %v292_v26  ;;  %v264_v9 = vld [vmem:[%s4803_s1 + $0x6b8] sm:$0xff]  ;;  %v135_v10 = vld [vmem:[%s4803_s1 + $0x2b0] sm:$0xff] }
  0x6e   :  { %404 = vmatmul.mubr.f32.gmra.mxu0 %v3125_v27  ;;  %516 = vmatprep.mubr.f32.mxu1 %v3130_v28  ;;  %v263_v11 = vld [vmem:[%s4803_s1 + $0x6b0] sm:$0xff]  ;;  %v132_v14 = vld [vmem:[%s4803_s1 + $0x298] sm:$0xff] }
  0x6f   :  { %592 = vmatpush2.msra.mxu0 %v163_v29  ;;  %705 = vmatpush2.msra.mxu1 %v291_v30  ;;  %v260_v17 = vld [vmem:[%s4803_s1 + $0x698] sm:$0xff]  ;;  %v131_v21 = vld [vmem:[%s4803_s1 + $0x290] sm:$0xff] }
  0x70   :  { %593 = vmatprep.subr.mxu0 %v160_v31  ;;  %517 = vmatmul.mubr.f32.gmra.mxu1 %v3146_v32  ;;  %v3322_v19 = vld [vmem:[%s4804_s0 + $0xd8] sm:$0xff]  ;;  %v259_v22 = vld [vmem:[%s4803_s1 + $0x690] sm:$0xff]  ;;  %v3353_v31 = vld [vmem:[%s4804_s0 + $0xe8] sm:$0xff] }
  0x71   :  { %706 = vmatprep.subr.mxu1 %v288_v33  ;;  %594 = vmatpush2.msra.mxu0 %v159_v34  ;;  %v128_v23 = vld [vmem:[%s4803_s1 + $0x278] sm:$0xff]  ;;  %v3338_v25 = vld [vmem:[%s4804_s0 + $0xd0] sm:$0xff] }
  0x72   :  { %707 = vmatpush2.msra.mxu1 %v287_v35  ;;  %409 = vmatprep.mubr.f32.mxu0 %v3161_v36  ;;  %v256_v26 = vld [vmem:[%s4803_s1 + $0x678] sm:$0xff]  ;;  %v127_v29 = vld [vmem:[%s4803_s1 + $0x270] sm:$0xff]  ;;  %v3365_v35 = vld [vmem:[%s4804_s0 + $0xe0] sm:$0xff] }
  0x73   :  { %595 = vmatprep.subr.mxu0 %v156_v37  ;;  %708 = vmatprep.subr.mxu1 %v284_v38  ;;  %v255_v30 = vld [vmem:[%s4803_s1 + $0x670] sm:$0xff]  ;;  %v124_v33 = vld [vmem:[%s4803_s1 + $0x258] sm:$0xff] }
  0x74   :  { %410 = vmatmul.mubr.f32.gmra.mxu0 %v3173_v39  ;;  %522 = vmatprep.mubr.f32.mxu1 %v3178_v40  ;;  %v252_v34 = vld [vmem:[%s4803_s1 + $0x658] sm:$0xff]  ;;  %v123_v38 = vld [vmem:[%s4803_s1 + $0x250] sm:$0xff] }
  0x75   :  { %596 = vmatpush2.msra.mxu0 %v155_v41  ;;  %709 = vmatpush2.msra.mxu1 %v283_v42  ;;  %v3370_v37 = vld [vmem:[%s4804_s0 + $0xf8] sm:$0xff]  ;;  %v251_v41 = vld [vmem:[%s4803_s1 + $0x650] sm:$0xff] }
  0x76   :  { %597 = vmatprep.subr.mxu0 %v152_v43  ;;  %523 = vmatmul.mubr.f32.gmra.mxu1 %v3194_v44  ;;  %v120_v42 = vld [vmem:[%s4803_s1 + $0x238] sm:$0xff]  ;;  %v3386_v43 = vld [vmem:[%s4804_s0 + $0xf0] sm:$0xff] }
  0x77   :  { %710 = vmatprep.subr.mxu1 %v280_v45  ;;  %598 = vmatpush2.msra.mxu0 %v151_v46  ;;  %v248_v45 = vld [vmem:[%s4803_s1 + $0x638] sm:$0xff]  ;;  %v119_v46 = vld [vmem:[%s4803_s1 + $0x230] sm:$0xff] }
  0x78   :  { %711 = vmatpush2.msra.mxu1 %v279_v47  ;;  %415 = vmatprep.mubr.f32.mxu0 %v3209_v48  ;;  %v247_v47 = vld [vmem:[%s4803_s1 + $0x630] sm:$0xff] }
  0x79   :  { %599 = vmatprep.subr.mxu0 %v148_v49  ;;  %712 = vmatprep.subr.mxu1 %v276_v50  ;;  %v116_v49 = vld [vmem:[%s4803_s1 + $0x218] sm:$0xff] }
  0x7a   :  { %416 = vmatmul.mubr.f32.gmra.mxu0 %v3221_v51  ;;  %528 = vmatprep.mubr.f32.mxu1 %v3226_v52  ;;  %v244_v50 = vld [vmem:[%s4803_s1 + $0x618] sm:$0xff] }
  0x7b   :  { %600 = vmatpush2.msra.mxu0 %v147_v53  ;;  %713 = vmatpush2.msra.mxu1 %v275_v54  ;;  %v115_v53 = vld [vmem:[%s4803_s1 + $0x210] sm:$0xff] }
  0x7c   :  { %601 = vmatprep.subr.mxu0 %v144_v55  ;;  %529 = vmatmul.mubr.f32.gmra.mxu1 %v3242_v56  ;;  %v243_v54 = vld [vmem:[%s4803_s1 + $0x610] sm:$0xff]  ;;  %v3415_v55 = vld [vmem:[%s4805_s2 + $0x1e8] sm:$0xff] }
  0x7d   :  { %714 = vmatprep.subr.mxu1 %v272_v57  ;;  %602 = vmatpush2.msra.mxu0 %v143_v58  ;;  %4909 = vst [vmem:[#allocation2_spill] sm:$0xff] %v3415_v55  ;;  %v3420_v57 = vld [vmem:[%s4805_s2 + $0x1f8] sm:$0xff]  ;;  %v3426_v58 = vld [vmem:[%s4805_s2 + $0x1e0] sm:$0xff] }
  0x7e   :  { %715 = vmatpush2.msra.mxu1 %v271_v59  ;;  %421 = vmatprep.mubr.f32.mxu0 %v3257_v60  ;;  %4910 = vst [vmem:[#allocation3_spill] sm:$0xff] %v3420_v57  ;;  %v3438_v59 = vld [vmem:[%s4805_s2 + $0x1c8] sm:$0xff] }
  0x7f   :  { %603 = vmatprep.subr.mxu0 %v140_v61  ;;  %716 = vmatprep.subr.mxu1 %v268_v62  ;;  %v3466_v61 = vld [vmem:[%s4805_s2 + $0x1a8] sm:$0xff]  ;;  %v3471_v62 = vld [vmem:[%s4805_s2 + $0x1b8] sm:$0xff] }
  0x80   :  { %422 = vmatmul.mubr.f32.gmra.mxu0 %v3269_v0  ;;  %534 = vmatprep.mubr.f32.mxu1 %v3274_v3 }
  0x81   :  { %604 = vmatpush2.msra.mxu0 %v139_v4  ;;  %717 = vmatpush2.msra.mxu1 %v267_v6  ;;  %v3490_v4 = vld [vmem:[%s4805_s2 + $0x188] sm:$0xff]  ;;  %v3495_v6 = vld [vmem:[%s4805_s2 + $0x198] sm:$0xff] }
  0x82   :  { %605 = vmatprep.subr.mxu0 %v136_v7  ;;  %535 = vmatmul.mubr.f32.gmra.mxu1 %v3290_v8  ;;  %v3518_v7 = vld [vmem:[%s4805_s2 + $0x168] sm:$0xff] }
  0x83   :  { %718 = vmatprep.subr.mxu1 %v264_v9  ;;  %606 = vmatpush2.msra.mxu0 %v135_v10  ;;  %v3523_v9 = vld [vmem:[%s4805_s2 + $0x178] sm:$0xff]  ;;  %v3542_v10 = vld [vmem:[%s4805_s2 + $0x148] sm:$0xff] }
  0x84   :  { %719 = vmatpush2.msra.mxu1 %v263_v11  ;;  %427 = vmatprep.mubr.f32.mxu0 %v3305_v13  ;;  %v3547_v11 = vld [vmem:[%s4805_s2 + $0x158] sm:$0xff] }
  0x85   :  { %607 = vmatprep.subr.mxu0 %v132_v14  ;;  %720 = vmatprep.subr.mxu1 %v260_v17  ;;  %v3570_v14 = vld [vmem:[%s4805_s2 + $0x128] sm:$0xff]  ;;  %v3575_v17 = vld [vmem:[%s4805_s2 + $0x138] sm:$0xff] }
  0x86   :  { %428 = vmatmul.mubr.f32.gmra.mxu0 %v3317_v18  ;;  %540 = vmatprep.mubr.f32.mxu1 %v3322_v19 }
  0x87   :  { %608 = vmatpush2.msra.mxu0 %v131_v21  ;;  %721 = vmatpush2.msra.mxu1 %v259_v22  ;;  %v3594_v21 = vld [vmem:[%s4805_s2 + $0x108] sm:$0xff]  ;;  %v3599_v22 = vld [vmem:[%s4805_s2 + $0x118] sm:$0xff] }
  0x88   :  { %609 = vmatprep.subr.mxu0 %v128_v23  ;;  %541 = vmatmul.mubr.f32.gmra.mxu1 %v3338_v25  ;;  %v3622_v23 = vld [vmem:[%s4805_s2 + $0xe8] sm:$0xff] }
  0x89   :  { %722 = vmatprep.subr.mxu1 %v256_v26  ;;  %610 = vmatpush2.msra.mxu0 %v127_v29  ;;  %v3627_v26 = vld [vmem:[%s4805_s2 + $0xf8] sm:$0xff]  ;;  %v3646_v29 = vld [vmem:[%s4805_s2 + $0xc8] sm:$0xff] }
  0x8a   :  { %723 = vmatpush2.msra.mxu1 %v255_v30  ;;  %433 = vmatprep.mubr.f32.mxu0 %v3353_v31  ;;  %v3651_v30 = vld [vmem:[%s4805_s2 + $0xd8] sm:$0xff] }
  0x8b   :  { %611 = vmatprep.subr.mxu0 %v124_v33  ;;  %724 = vmatprep.subr.mxu1 %v252_v34  ;;  %4911 = vst [vmem:[#allocation4_spill] sm:$0xff] %v3651_v30  ;;  %v3674_v33 = vld [vmem:[%s4805_s2 + $0xa8] sm:$0xff]  ;;  %v3679_v34 = vld [vmem:[%s4805_s2 + $0xb8] sm:$0xff] }
  0x8c   :  { %434 = vmatmul.mubr.f32.gmra.mxu0 %v3365_v35  ;;  %546 = vmatprep.mubr.f32.mxu1 %v3370_v37  ;;  %4914 = vst [vmem:[#allocation7_spill] sm:$0xff] %v3674_v33  ;;  %4915 = vst [vmem:[#allocation8_spill] sm:$0xff] %v3679_v34 }
  0x8d   :  { %612 = vmatpush2.msra.mxu0 %v123_v38  ;;  %725 = vmatpush2.msra.mxu1 %v251_v41  ;;  %v3698_v38 = vld [vmem:[%s4805_s2 + $0x88] sm:$0xff]  ;;  %v3703_v41 = vld [vmem:[%s4805_s2 + $0x98] sm:$0xff] }
  0x8e   :  { %613 = vmatprep.subr.mxu0 %v120_v42  ;;  %547 = vmatmul.mubr.f32.gmra.mxu1 %v3386_v43  ;;  %4918 = vst [vmem:[#allocation11_spill] sm:$0xff] %v3698_v38  ;;  %4919 = vst [vmem:[#allocation12_spill] sm:$0xff] %v3703_v41  ;;  %v3726_v42 = vld [vmem:[%s4805_s2 + $0x68] sm:$0xff] }
  0x8f   :  { %726 = vmatprep.subr.mxu1 %v248_v45  ;;  %614 = vmatpush2.msra.mxu0 %v119_v46  ;;  %4922 = vst [vmem:[#allocation15_spill] sm:$0xff] %v3726_v42  ;;  %v3731_v45 = vld [vmem:[%s4805_s2 + $0x78] sm:$0xff]  ;;  %v3750_v46 = vld [vmem:[%s4805_s2 + $0x48] sm:$0xff] }
  0x90   :  { %727 = vmatpush2.msra.mxu1 %v247_v47  ;;  %615 = vmatprep.subr.mxu0 %v116_v49  ;;  %4923 = vst [vmem:[#allocation16_spill] sm:$0xff] %v3731_v45  ;;  %4926 = vst [vmem:[#allocation19_spill] sm:$0xff] %v3750_v46  ;;  %v3755_v47 = vld [vmem:[%s4805_s2 + $0x58] sm:$0xff]  ;;  %v3778_v49 = vld [vmem:[%s4805_s2 + $0x28] sm:$0xff] }
  0x91   :  { %728 = vmatprep.subr.mxu1 %v244_v50  ;;  %616 = vmatpush2.msra.mxu0 %v115_v53  ;;  %4927 = vst [vmem:[#allocation20_spill] sm:$0xff] %v3755_v47  ;;  %4930 = vst [vmem:[#allocation23_spill] sm:$0xff] %v3778_v49  ;;  %v3783_v50 = vld [vmem:[%s4805_s2 + $0x38] sm:$0xff]  ;;  %v3802_v53 = vld [vmem:[%s4805_s2 + $0x8] sm:$0xff] }
  0x92   :  { %617 = vmatprep.mubr.f32.mxu0 %v2835_v63  ;;  %729 = vmatpush2.msra.mxu1 %v243_v54  ;;  %v3431_v63 = vld [vmem:[%s4805_s2 + $0x1f0] sm:$0xff]  ;;  %4931 = vst [vmem:[#allocation24_spill] sm:$0xff] %v3783_v50  ;;  %4934 = vst [vmem:[#allocation27_spill] sm:$0xff] %v3802_v53  ;;  %v3807_v54 = vld [vmem:[%s4805_s2 + $0x18] sm:$0xff] }
  0x93   :  { %730 = vmatprep.mubr.f32.mxu1 %v2848_v2  ;;  %618 = vmatmul.mubr.f32.vlgmr.msra.gmra.mxu0 %v2843_v1  ;;  %v3443_v2 = vld [vmem:[%s4805_s2 + $0x1d8] sm:$0xff]  ;;  %v3452_v1 = vld [vmem:[%s4805_s2 + $0x1c0] sm:$0xff]  ;;  %4935 = vst [vmem:[#allocation28_spill] sm:$0xff] %v3807_v54 }
  0x94   :  { %731 = vmatmul.mubr.f32.vlgmr.msra.gmra.mxu1 %v2860_v5  ;;  %843 = vmatprep.subr.mxu0 %v3415_v55  ;;  %v3457_v5 = vld [vmem:[%s4805_s2 + $0x1d0] sm:$0xff] }
  0x95   :  { %914 = vmatprep.subr.mxu1 %v3420_v57  ;;  %844 = vmatpush1.msra.mxu0 %v3426_v58 }
  0x96   :  { %915 = vmatpush1.msra.mxu1 %v3431_v63  ;;  %845 = vmatprep.subr.mxu0 %v3438_v59 }
  0x97   :  { %916 = vmatprep.subr.mxu1 %v3443_v2  ;;  %623 = vmatprep.mubr.f32.mxu0 %v3066_v12  ;;  %v3478_v12 = vld [vmem:[%s4805_s2 + $0x1a0] sm:$0xff] }
  0x98   :  { %736 = vmatprep.mubr.f32.mxu1 %v3082_v16  ;;  %846 = vmatpush1.msra.mxu0 %v3452_v1  ;;  %v3483_v16 = vld [vmem:[%s4805_s2 + $0x1b0] sm:$0xff] }
  0x99   :  { %917 = vmatpush1.msra.mxu1 %v3457_v5  ;;  %624 = vmatmul.mubr.f32.gmra.mxu0 %v3077_v15  ;;  %v3504_v15 = vld [vmem:[%s4805_s2 + $0x180] sm:$0xff] }
  0x9a   :  { %737 = vmatmul.mubr.f32.gmra.mxu1 %v3098_v20  ;;  %847 = vmatprep.subr.mxu0 %v3466_v61  ;;  %v3509_v20 = vld [vmem:[%s4805_s2 + $0x190] sm:$0xff] }
  0x9b   :  { %918 = vmatprep.subr.mxu1 %v3471_v62  ;;  %848 = vmatpush1.msra.mxu0 %v3478_v12 }
  0x9c   :  { %919 = vmatpush1.msra.mxu1 %v3483_v16  ;;  %849 = vmatprep.subr.mxu0 %v3490_v4 }
  0x9d   :  { %920 = vmatprep.subr.mxu1 %v3495_v6  ;;  %629 = vmatprep.mubr.f32.mxu0 %v3113_v24  ;;  %v3530_v24 = vld [vmem:[%s4805_s2 + $0x160] sm:$0xff] }
  0x9e   :  { %742 = vmatprep.mubr.f32.mxu1 %v3130_v28  ;;  %850 = vmatpush1.msra.mxu0 %v3504_v15  ;;  %v3535_v28 = vld [vmem:[%s4805_s2 + $0x170] sm:$0xff] }
  0x9f   :  { %921 = vmatpush1.msra.mxu1 %v3509_v20  ;;  %630 = vmatmul.mubr.f32.gmra.mxu0 %v3125_v27  ;;  %v3556_v27 = vld [vmem:[%s4805_s2 + $0x140] sm:$0xff] }
  0xa0   :  { %743 = vmatmul.mubr.f32.gmra.mxu1 %v3146_v32  ;;  %851 = vmatprep.subr.mxu0 %v3518_v7  ;;  %v3561_v32 = vld [vmem:[%s4805_s2 + $0x150] sm:$0xff] }
  0xa1   :  { %922 = vmatprep.subr.mxu1 %v3523_v9  ;;  %852 = vmatpush1.msra.mxu0 %v3530_v24 }
  0xa2   :  { %923 = vmatpush1.msra.mxu1 %v3535_v28  ;;  %853 = vmatprep.subr.mxu0 %v3542_v10 }
  0xa3   :  { %924 = vmatprep.subr.mxu1 %v3547_v11  ;;  %635 = vmatprep.mubr.f32.mxu0 %v3161_v36  ;;  %v3582_v36 = vld [vmem:[%s4805_s2 + $0x120] sm:$0xff] }
  0xa4   :  { %748 = vmatprep.mubr.f32.mxu1 %v3178_v40  ;;  %854 = vmatpush1.msra.mxu0 %v3556_v27  ;;  %v3587_v40 = vld [vmem:[%s4805_s2 + $0x130] sm:$0xff] }
  0xa5   :  { %925 = vmatpush1.msra.mxu1 %v3561_v32  ;;  %636 = vmatmul.mubr.f32.gmra.mxu0 %v3173_v39  ;;  %v3608_v39 = vld [vmem:[%s4805_s2 + $0x100] sm:$0xff] }
  0xa6   :  { %749 = vmatmul.mubr.f32.gmra.mxu1 %v3194_v44  ;;  %855 = vmatprep.subr.mxu0 %v3570_v14  ;;  %v3613_v44 = vld [vmem:[%s4805_s2 + $0x110] sm:$0xff] }
  0xa7   :  { %926 = vmatprep.subr.mxu1 %v3575_v17  ;;  %856 = vmatpush1.msra.mxu0 %v3582_v36 }
  0xa8   :  { %927 = vmatpush1.msra.mxu1 %v3587_v40  ;;  %857 = vmatprep.subr.mxu0 %v3594_v21 }
  0xa9   :  { %928 = vmatprep.subr.mxu1 %v3599_v22  ;;  %641 = vmatprep.mubr.f32.mxu0 %v3209_v48  ;;  %v3634_v48 = vld [vmem:[%s4805_s2 + $0xe0] sm:$0xff] }
  0xaa   :  { %754 = vmatprep.mubr.f32.mxu1 %v3226_v52  ;;  %858 = vmatpush1.msra.mxu0 %v3608_v39  ;;  %v3639_v52 = vld [vmem:[%s4805_s2 + $0xf0] sm:$0xff] }
  0xab   :  { %929 = vmatpush1.msra.mxu1 %v3613_v44  ;;  %642 = vmatmul.mubr.f32.gmra.mxu0 %v3221_v51  ;;  %v3660_v51 = vld [vmem:[%s4805_s2 + $0xc0] sm:$0xff] }
  0xac   :  { %755 = vmatmul.mubr.f32.gmra.mxu1 %v3242_v56  ;;  %859 = vmatprep.subr.mxu0 %v3622_v23  ;;  %4912 = vst [vmem:[#allocation5_spill] sm:$0xff] %v3660_v51  ;;  %v3665_v56 = vld [vmem:[%s4805_s2 + $0xd0] sm:$0xff] }
  0xad   :  { %930 = vmatprep.subr.mxu1 %v3627_v26  ;;  %860 = vmatpush1.msra.mxu0 %v3634_v48  ;;  %4913 = vst [vmem:[#allocation6_spill] sm:$0xff] %v3665_v56 }
  0xae   :  { %931 = vmatpush1.msra.mxu1 %v3639_v52  ;;  %861 = vmatprep.subr.mxu0 %v3646_v29 }
  0xaf   :  { %932 = vmatprep.subr.mxu1 %v3651_v30  ;;  %647 = vmatprep.mubr.f32.mxu0 %v3257_v60  ;;  %v3686_v60 = vld [vmem:[%s4805_s2 + $0xa0] sm:$0xff] }
  0xb0   :  { %760 = vmatprep.mubr.f32.mxu1 %v3274_v3  ;;  %862 = vmatpush1.msra.mxu0 %v3660_v51  ;;  %4916 = vst [vmem:[#allocation9_spill] sm:$0xff] %v3686_v60  ;;  %v3691_v3 = vld [vmem:[%s4805_s2 + $0xb0] sm:$0xff] }
  0xb1   :  { %933 = vmatpush1.msra.mxu1 %v3665_v56  ;;  %4917 = vst [vmem:[#allocation10_spill] sm:$0xff] %v3691_v3  ;;  %648 = vmatmul.mubr.f32.gmra.mxu0 %v3269_v0  ;;  %v3712_v0 = vld [vmem:[%s4805_s2 + $0x80] sm:$0xff] }
  0xb2   :  { %761 = vmatmul.mubr.f32.gmra.mxu1 %v3290_v8  ;;  %863 = vmatprep.subr.mxu0 %v3674_v33  ;;  %4920 = vst [vmem:[#allocation13_spill] sm:$0xff] %v3712_v0  ;;  %v3717_v8 = vld [vmem:[%s4805_s2 + $0x90] sm:$0xff] }
  0xb3   :  { %934 = vmatprep.subr.mxu1 %v3679_v34  ;;  %864 = vmatpush1.msra.mxu0 %v3686_v60  ;;  %4921 = vst [vmem:[#allocation14_spill] sm:$0xff] %v3717_v8 }
  0xb4   :  { %935 = vmatpush1.msra.mxu1 %v3691_v3  ;;  %865 = vmatprep.subr.mxu0 %v3698_v38 }
  0xb5   :  { %936 = vmatprep.subr.mxu1 %v3703_v41  ;;  %653 = vmatprep.mubr.f32.mxu0 %v3305_v13  ;;  %v3738_v13 = vld [vmem:[%s4805_s2 + $0x60] sm:$0xff] }
  0xb6   :  { %766 = vmatprep.mubr.f32.mxu1 %v3322_v19  ;;  %866 = vmatpush1.msra.mxu0 %v3712_v0  ;;  %4924 = vst [vmem:[#allocation17_spill] sm:$0xff] %v3738_v13  ;;  %v3743_v19 = vld [vmem:[%s4805_s2 + $0x70] sm:$0xff] }
  0xb7   :  { %937 = vmatpush1.msra.mxu1 %v3717_v8  ;;  %4925 = vst [vmem:[#allocation18_spill] sm:$0xff] %v3743_v19  ;;  %654 = vmatmul.mubr.f32.gmra.mxu0 %v3317_v18  ;;  %v3764_v18 = vld [vmem:[%s4805_s2 + $0x40] sm:$0xff] }
  0xb8   :  { %767 = vmatmul.mubr.f32.gmra.mxu1 %v3338_v25  ;;  %867 = vmatprep.subr.mxu0 %v3726_v42  ;;  %4928 = vst [vmem:[#allocation21_spill] sm:$0xff] %v3764_v18  ;;  %v3769_v25 = vld [vmem:[%s4805_s2 + $0x50] sm:$0xff] }
  0xb9   :  { %938 = vmatprep.subr.mxu1 %v3731_v45  ;;  %868 = vmatpush1.msra.mxu0 %v3738_v13  ;;  %4929 = vst [vmem:[#allocation22_spill] sm:$0xff] %v3769_v25 }
  0xba   :  { %939 = vmatpush1.msra.mxu1 %v3743_v19  ;;  %869 = vmatprep.subr.mxu0 %v3750_v46 }
  0xbb   :  { %940 = vmatprep.subr.mxu1 %v3755_v47  ;;  %659 = vmatprep.mubr.f32.mxu0 %v3353_v31  ;;  %v3790_v31 = vld [vmem:[%s4805_s2 + $0x20] sm:$0xff] }
  0xbc   :  { %772 = vmatprep.mubr.f32.mxu1 %v3370_v37  ;;  %870 = vmatpush1.msra.mxu0 %v3764_v18  ;;  %4932 = vst [vmem:[#allocation25_spill] sm:$0xff] %v3790_v31  ;;  %v3795_v37 = vld [vmem:[%s4805_s2 + $0x30] sm:$0xff] }
  0xbd   :  { %941 = vmatpush1.msra.mxu1 %v3769_v25  ;;  %4933 = vst [vmem:[#allocation26_spill] sm:$0xff] %v3795_v37  ;;  %660 = vmatmul.mubr.f32.gmra.mxu0 %v3365_v35  ;;  %v3814_v35 = vld [vmem:[%s4805_s2] sm:$0xff] }
  0xbe   :  { %773 = vmatmul.mubr.f32.gmra.mxu1 %v3386_v43  ;;  %871 = vmatprep.subr.mxu0 %v3778_v49  ;;  %4936 = vst [vmem:[#allocation29_spill] sm:$0xff] %v3814_v35  ;;  %v3821_v43 = vld [vmem:[%s4805_s2 + $0x10] sm:$0xff] }
  0xbf   :  { %942 = vmatprep.subr.mxu1 %v3783_v50  ;;  %872 = vmatpush1.msra.mxu0 %v3790_v31  ;;  %4937 = vst [vmem:[#allocation30_spill] sm:$0xff] %v3821_v43  ;;  %v4810_v50 = vmov 0.0  }
  0xc0   :  { %943 = vmatpush1.msra.mxu1 %v3795_v37  ;;  %873 = vmatprep.subr.mxu0 %v3802_v53 }
  0xc1   :  { %944 = vmatprep.subr.mxu1 %v3807_v54  ;;  %874 = vmatpush1.msra.mxu0 %v3814_v35 }
  0xc2   :  { %907 = vmatprep.mubr.f32.mxu0 %v4810_v50  ;;  %945 = vmatpush1.msra.mxu1 %v3821_v43 }
  0xc3   :  { %978 = vmatprep.mubr.f32.mxu1 %v4810_v50  ;;  %908 = vmatmul.mubr.f32.vlgmr.msra.gmra.mxu0 %v4810_v50 }
  0xc4   :  { %979 = vmatmul.mubr.f32.vlgmr.msra.gmra.mxu1 %v4810_v50  ;;  %1013 = vmatprep.subr.mxu0 %v3415_v55  ;;  %v4938_v50 = vld [vmem:[#allocation24_spill] sm:$0xff] }
  0xc5   :  { %1084 = vmatprep.subr.mxu1 %v3420_v57  ;;  %1014 = vmatpush1.msra.mxu0 %v3426_v58 }
  0xc6   :  { %1085 = vmatpush1.msra.mxu1 %v3431_v63  ;;  %1015 = vmatprep.subr.mxu0 %v3438_v59 }
  0xc7   :  { %1086 = vmatprep.subr.mxu1 %v3443_v2  ;;  %1016 = vmatpush1.msra.mxu0 %v3452_v1 }
  0xc8   :  { %1087 = vmatpush1.msra.mxu1 %v3457_v5  ;;  %1017 = vmatprep.subr.mxu0 %v3466_v61 }
  0xc9   :  { %1088 = vmatprep.subr.mxu1 %v3471_v62  ;;  %1018 = vmatpush1.msra.mxu0 %v3478_v12 }
  0xca   :  { %1089 = vmatpush1.msra.mxu1 %v3483_v16  ;;  %1019 = vmatprep.subr.mxu0 %v3490_v4 }
  0xcb   :  { %1090 = vmatprep.subr.mxu1 %v3495_v6  ;;  %1020 = vmatpush1.msra.mxu0 %v3504_v15 }
  0xcc   :  { %1091 = vmatpush1.msra.mxu1 %v3509_v20  ;;  %1021 = vmatprep.subr.mxu0 %v3518_v7 }
  0xcd   :  { %1092 = vmatprep.subr.mxu1 %v3523_v9  ;;  %1022 = vmatpush1.msra.mxu0 %v3530_v24 }
  0xce   :  { %1093 = vmatpush1.msra.mxu1 %v3535_v28  ;;  %1023 = vmatprep.subr.mxu0 %v3542_v10 }
  0xcf   :  { %1094 = vmatprep.subr.mxu1 %v3547_v11  ;;  %1024 = vmatpush1.msra.mxu0 %v3556_v27 }
  0xd0   :  { %1095 = vmatpush1.msra.mxu1 %v3561_v32  ;;  %1025 = vmatprep.subr.mxu0 %v3570_v14 }
  0xd1   :  { %1096 = vmatprep.subr.mxu1 %v3575_v17  ;;  %1026 = vmatpush1.msra.mxu0 %v3582_v36 }
  0xd2   :  { %1097 = vmatpush1.msra.mxu1 %v3587_v40  ;;  %1027 = vmatprep.subr.mxu0 %v3594_v21 }
  0xd3   :  { %1098 = vmatprep.subr.mxu1 %v3599_v22  ;;  %1028 = vmatpush1.msra.mxu0 %v3608_v39 }
  0xd4   :  { %1099 = vmatpush1.msra.mxu1 %v3613_v44  ;;  %1029 = vmatprep.subr.mxu0 %v3622_v23 }
  0xd5   :  { %1100 = vmatprep.subr.mxu1 %v3627_v26  ;;  %1030 = vmatpush1.msra.mxu0 %v3634_v48 }
  0xd6   :  { %1101 = vmatpush1.msra.mxu1 %v3639_v52  ;;  %1031 = vmatprep.subr.mxu0 %v3646_v29 }
  0xd7   :  { %1102 = vmatprep.subr.mxu1 %v3651_v30  ;;  %1032 = vmatpush1.msra.mxu0 %v3660_v51 }
  0xd8   :  { %1103 = vmatpush1.msra.mxu1 %v3665_v56  ;;  %1033 = vmatprep.subr.mxu0 %v3674_v33 }
  0xd9   :  { %1104 = vmatprep.subr.mxu1 %v3679_v34  ;;  %1034 = vmatpush1.msra.mxu0 %v3686_v60 }
  0xda   :  { %1105 = vmatpush1.msra.mxu1 %v3691_v3  ;;  %1035 = vmatprep.subr.mxu0 %v3698_v38 }
  0xdb   :  { %1106 = vmatprep.subr.mxu1 %v3703_v41  ;;  %1036 = vmatpush1.msra.mxu0 %v3712_v0 }
  0xdc   :  { %1107 = vmatpush1.msra.mxu1 %v3717_v8  ;;  %1037 = vmatprep.subr.mxu0 %v3726_v42 }
  0xdd   :  { %1108 = vmatprep.subr.mxu1 %v3731_v45  ;;  %1038 = vmatpush1.msra.mxu0 %v3738_v13 }
  0xde   :  { %1109 = vmatpush1.msra.mxu1 %v3743_v19  ;;  %1039 = vmatprep.subr.mxu0 %v3750_v46  ;;  %v4939_v46 = vmov 0.0  }
  0xdf   :  { %1110 = vmatprep.subr.mxu1 %v3755_v47  ;;  %1040 = vmatpush1.msra.mxu0 %v3764_v18 }
  0xe0   :  { %1111 = vmatpush1.msra.mxu1 %v3769_v25  ;;  %1041 = vmatprep.subr.mxu0 %v3778_v49 }
  0xe1   :  { %1112 = vmatprep.subr.mxu1 %v4938_v50  ;;  %1042 = vmatpush1.msra.mxu0 %v3790_v31  ;;  %v307_v50 = vlaneseq }
  0xe2   :  { %1113 = vmatpush1.msra.mxu1 %v3795_v37  ;;  %1043 = vmatprep.subr.mxu0 %v3802_v53 }
  0xe3   :  { %1114 = vmatprep.subr.mxu1 %v3807_v54  ;;  %1044 = vmatpush1.msra.mxu0 %v3814_v35  ;;  %v3899_v31 = vshrl.u32 %v307_v50, 7  ;;  %v3907_v35 = vld [vmem:[%s4806_s3] sm:$0xf] }
  0xe4   :  { %1077 = vmatprep.mubr.f32.mxu0 %v4939_v46  ;;  %1115 = vmatpush1.msra.mxu1 %v3821_v43 }
  0xe5   :  { %1148 = vmatprep.mubr.f32.mxu1 %v4939_v46  ;;  %1183 = vmatprep.subr.mxu0 %v3415_v55  ;;  %v309_v53 = vsub.s32 0, %v3899_v31  ;;  %v313_v43 = vsub.s32 1, %v3899_v31 }
  0xe6   :  { %1254 = vmatprep.subr.mxu1 %v3420_v57 }
  0xe7   :  { %v3915_v57 = vrot.slane %v3907_v35, %v309_v53  ;;  %v3918_v55 = vrot.slane %v3907_v35, %v313_v43 }
 0x103   :  { %v3901_v37 = vpop.f32.mrf.mxu0 }
 0x105   :  { %v3910_v54 = vpop.f32.mrf.mxu1  ;;  %v3912_v46 = vpop.f32.mrf.mxu0 }
 0x107   :  { %v3920_v49 = vpop.f32.mrf.mxu1 }
 0x128   :  { %v399_v50 = vpop.f32.mrf.mxu0 }
 0x129   :  { %v400_v25 = vadd.f32 %v399_v50, %v3915_v57 }
 0x12a   :  { %v401_v18 = vpop.f32.mrf.mxu0  ;;  %v512_v47 = vpop.f32.mrf.mxu1 }
 0x12b   :  { %v402_v19 = vadd.f32 %v401_v18, %v3918_v55  ;;  %v3924_v13 = vadd.f32 %v512_v47, %v400_v25 }
 0x12c   :  { %v514_v45 = vpop.f32.mrf.mxu1 }
 0x12d   :  { %4940 = vst [vmem:[#allocation31_spill] sm:$0xff] %v3924_v13  ;;  %v3926_v42 = vadd.f32 %v514_v45, %v402_v19 }
 0x12e   :  { %v405_v8 = vpop.f32.mrf.mxu0 }
 0x12f   :  { %4941 = vst [vmem:[#allocation32_spill] sm:$0xff] %v3926_v42  ;;  %v406_v53 = vadd.f32 %v405_v8, %v3915_v57 }
 0x130   :  { %v407_v0 = vpop.f32.mrf.mxu0  ;;  %v518_v41 = vpop.f32.mrf.mxu1 }
 0x131   :  { %v408_v43 = vadd.f32 %v407_v0, %v3918_v55  ;;  %v3930_v38 = vadd.f32 %v518_v41, %v406_v53 }
 0x132   :  { %v520_v3 = vpop.f32.mrf.mxu1 }
 0x133   :  { %4942 = vst [vmem:[#allocation33_spill] sm:$0xff] %v3930_v38  ;;  %v3932_v50 = vadd.f32 %v520_v3, %v408_v43 }
 0x134   :  { %v411_v60 = vpop.f32.mrf.mxu0 }
 0x135   :  { %4943 = vst [vmem:[#allocation34_spill] sm:$0xff] %v3932_v50  ;;  %v412_v18 = vadd.f32 %v411_v60, %v3915_v57 }
 0x136   :  { %v413_v47 = vpop.f32.mrf.mxu0  ;;  %v524_v25 = vpop.f32.mrf.mxu1 }
 0x137   :  { %v414_v45 = vadd.f32 %v413_v47, %v3918_v55  ;;  %v3936_v19 = vadd.f32 %v524_v25, %v412_v18 }
 0x138   :  { %v526_v42 = vpop.f32.mrf.mxu1 }
 0x139   :  { %4944 = vst [vmem:[#allocation35_spill] sm:$0xff] %v3936_v19  ;;  %v3938_v8 = vadd.f32 %v526_v42, %v414_v45 }
 0x13a   :  { %v417_v13 = vpop.f32.mrf.mxu0 }
 0x13b   :  { %4945 = vst [vmem:[#allocation36_spill] sm:$0xff] %v3938_v8  ;;  %v418_v0 = vadd.f32 %v417_v13, %v3915_v57 }
 0x13c   :  { %v419_v41 = vpop.f32.mrf.mxu0  ;;  %v530_v53 = vpop.f32.mrf.mxu1 }
 0x13d   :  { %v420_v3 = vadd.f32 %v419_v41, %v3918_v55  ;;  %v3942_v43 = vadd.f32 %v530_v53, %v418_v0 }
 0x13e   :  { %v532_v50 = vpop.f32.mrf.mxu1 }
 0x13f   :  { %4946 = vst [vmem:[#allocation37_spill] sm:$0xff] %v3942_v43  ;;  %v3944_v60 = vadd.f32 %v532_v50, %v420_v3 }
 0x140   :  { %v423_v38 = vpop.f32.mrf.mxu0 }
 0x141   :  { %4947 = vst [vmem:[#allocation38_spill] sm:$0xff] %v3944_v60  ;;  %v424_v47 = vadd.f32 %v423_v38, %v3915_v57 }
 0x142   :  { %v425_v18 = vpop.f32.mrf.mxu0  ;;  %v536_v25 = vpop.f32.mrf.mxu1 }
 0x143   :  { %v426_v42 = vadd.f32 %v425_v18, %v3918_v55  ;;  %v3948_v45 = vadd.f32 %v536_v25, %v424_v47 }
 0x144   :  { %v538_v8 = vpop.f32.mrf.mxu1 }
 0x145   :  { %4948 = vst [vmem:[#allocation39_spill] sm:$0xff] %v3948_v45  ;;  %v3950_v13 = vadd.f32 %v538_v8, %v426_v42 }
 0x146   :  { %v429_v19 = vpop.f32.mrf.mxu0 }
 0x147   :  { %4949 = vst [vmem:[#allocation40_spill] sm:$0xff] %v3950_v13  ;;  %v430_v41 = vadd.f32 %v429_v19, %v3915_v57 }
 0x148   :  { %v431_v0 = vpop.f32.mrf.mxu0  ;;  %v542_v53 = vpop.f32.mrf.mxu1 }
 0x149   :  { %v432_v50 = vadd.f32 %v431_v0, %v3918_v55  ;;  %v3954_v3 = vadd.f32 %v542_v53, %v430_v41  ;;  %v317_v41 = vsub.s32 2, %v3899_v31 }
 0x14a   :  { %v544_v60 = vpop.f32.mrf.mxu1 }
 0x14b   :  { %4950 = vst [vmem:[#allocation41_spill] sm:$0xff] %v3954_v3  ;;  %v3956_v38 = vadd.f32 %v544_v60, %v432_v50  ;;  %v3975_v50 = vrot.slane %v3907_v35, %v317_v41 }
 0x14c   :  { %v435_v43 = vpop.f32.mrf.mxu0 }
 0x14d   :  { %4951 = vst [vmem:[#allocation42_spill] sm:$0xff] %v3956_v38  ;;  %v436_v18 = vadd.f32 %v435_v43, %v3915_v57  ;;  %v321_v43 = vsub.s32 3, %v3899_v31 }
 0x14e   :  { %v437_v47 = vpop.f32.mrf.mxu0  ;;  %v548_v25 = vpop.f32.mrf.mxu1 }
 0x14f   :  { %v438_v8 = vadd.f32 %v437_v47, %v3918_v55  ;;  %v3960_v42 = vadd.f32 %v548_v25, %v436_v18 }
 0x150   :  { %v550_v13 = vpop.f32.mrf.mxu1 }
 0x151   :  { %4952 = vst [vmem:[#allocation43_spill] sm:$0xff] %v3960_v42  ;;  %v3962_v19 = vadd.f32 %v550_v13, %v438_v8  ;;  %v3978_v13 = vrot.slane %v3907_v35, %v321_v43 }
 0x153   :  { %4953 = vst [vmem:[#allocation44_spill] sm:$0xff] %v3962_v19  ;;  %v3964_v45 = vpop.f32.mrf.mxu0 }
 0x154   :  { %v3966_v0 = vpop.f32.mrf.mxu1 }
 0x155   :  { %v3969_v60 = vpop.f32.mrf.mxu0 }
 0x156   :  { %v3971_v53 = vpop.f32.mrf.mxu1 }
 0x159   :  { %v625_v18 = vpop.f32.mrf.mxu0 }
 0x15a   :  { %v738_v47 = vpop.f32.mrf.mxu1  ;;  %v626_v25 = vadd.f32 %v625_v18, %v3975_v50 }
 0x15b   :  { %v627_v8 = vpop.f32.mrf.mxu0 }
 0x15c   :  { %v740_v19 = vpop.f32.mrf.mxu1  ;;  %v3981_v42 = vadd.f32 %v738_v47, %v626_v25  ;;  %v628_v38 = vadd.f32 %v627_v8, %v3978_v13 }
 0x15e   :  { %4954 = vst [vmem:[#allocation45_spill] sm:$0xff] %v3981_v42  ;;  %v3984_v3 = vadd.f32 %v740_v19, %v628_v38 }
 0x15f   :  { %v631_v34 = vpop.f32.mrf.mxu0 }
 0x160   :  { %4955 = vst [vmem:[#allocation46_spill] sm:$0xff] %v3984_v3  ;;  %v744_v31 = vpop.f32.mrf.mxu1  ;;  %v632_v41 = vadd.f32 %v631_v34, %v3975_v50 }
 0x161   :  { %v633_v33 = vpop.f32.mrf.mxu0 }
 0x162   :  { %v746_v56 = vpop.f32.mrf.mxu1  ;;  %v3987_v51 = vadd.f32 %v744_v31, %v632_v41  ;;  %v634_v35 = vadd.f32 %v633_v33, %v3978_v13 }
 0x164   :  { %4956 = vst [vmem:[#allocation47_spill] sm:$0xff] %v3987_v51  ;;  %v3990_v43 = vadd.f32 %v746_v56, %v634_v35 }
 0x165   :  { %v637_v18 = vpop.f32.mrf.mxu0 }
 0x166   :  { %4957 = vst [vmem:[#allocation48_spill] sm:$0xff] %v3990_v43  ;;  %v750_v30 = vpop.f32.mrf.mxu1  ;;  %v638_v47 = vadd.f32 %v637_v18, %v3975_v50 }
 0x167   :  { %v639_v25 = vpop.f32.mrf.mxu0 }
 0x168   :  { %v752_v8 = vpop.f32.mrf.mxu1  ;;  %v3993_v38 = vadd.f32 %v750_v30, %v638_v47  ;;  %v640_v19 = vadd.f32 %v639_v25, %v3978_v13 }
 0x16a   :  { %4958 = vst [vmem:[#allocation49_spill] sm:$0xff] %v3993_v38  ;;  %v3996_v3 = vadd.f32 %v752_v8, %v640_v19 }
 0x16b   :  { %v643_v34 = vpop.f32.mrf.mxu0 }
 0x16c   :  { %4959 = vst [vmem:[#allocation50_spill] sm:$0xff] %v3996_v3  ;;  %v756_v42 = vpop.f32.mrf.mxu1  ;;  %v644_v31 = vadd.f32 %v643_v34, %v3975_v50 }
 0x16d   :  { %v645_v41 = vpop.f32.mrf.mxu0 }
 0x16e   :  { %v758_v33 = vpop.f32.mrf.mxu1  ;;  %v3999_v56 = vadd.f32 %v756_v42, %v644_v31  ;;  %v646_v35 = vadd.f32 %v645_v41, %v3978_v13 }
 0x170   :  { %4960 = vst [vmem:[#allocation51_spill] sm:$0xff] %v3999_v56  ;;  %v4002_v43 = vadd.f32 %v758_v33, %v646_v35 }
 0x171   :  { %v649_v18 = vpop.f32.mrf.mxu0 }
 0x172   :  { %4961 = vst [vmem:[#allocation52_spill] sm:$0xff] %v4002_v43  ;;  %v762_v51 = vpop.f32.mrf.mxu1  ;;  %v650_v30 = vadd.f32 %v649_v18, %v3975_v50 }
 0x173   :  { %v651_v47 = vpop.f32.mrf.mxu0 }
 0x174   :  { %v764_v25 = vpop.f32.mrf.mxu1  ;;  %v4005_v8 = vadd.f32 %v762_v51, %v650_v30  ;;  %v652_v19 = vadd.f32 %v651_v47, %v3978_v13  ;;  %v394_v51 = vadd.f32 %v3901_v37, %v3915_v57 }
 0x176   :  { %4962 = vst [vmem:[#allocation53_spill] sm:$0xff] %v4005_v8  ;;  %v4008_v3 = vadd.f32 %v764_v25, %v652_v19  ;;  %v396_v25 = vadd.f32 %v3912_v46, %v3918_v55  ;;  %v620_v55 = vadd.f32 %v3964_v45, %v3975_v50  ;;  %v4995_v8 = vld [vmem:[#allocation30_spill] sm:$0xff] }
 0x177   :  { %v655_v34 = vpop.f32.mrf.mxu0 }
 0x178   :  { %4963 = vst [vmem:[#allocation54_spill] sm:$0xff] %v4008_v3  ;;  %v768_v38 = vpop.f32.mrf.mxu1  ;;  %v656_v42 = vadd.f32 %v655_v34, %v3975_v50  ;;  %v4994_v3 = vmov 0.0  }
 0x179   :  { %v657_v31 = vpop.f32.mrf.mxu0 }
 0x17a   :  { %v770_v41 = vpop.f32.mrf.mxu1  ;;  %v4011_v33 = vadd.f32 %v768_v38, %v656_v42  ;;  %v658_v35 = vadd.f32 %v657_v31, %v3978_v13  ;;  %v507_v42 = vadd.f32 %v3910_v54, %v394_v51  ;;  %v622_v54 = vadd.f32 %v3969_v60, %v3978_v13 }
 0x17c   :  { %4964 = vst [vmem:[#allocation55_spill] sm:$0xff] %v4011_v33  ;;  %v4014_v43 = vadd.f32 %v770_v41, %v658_v35  ;;  %v509_v35 = vadd.f32 %v3920_v49, %v396_v25  ;;  %v735_v49 = vadd.f32 %v3971_v53, %v622_v54  ;;  %v4972_v54 = vld [vmem:[#allocation8_spill] sm:$0xff] }
 0x17d   :  { %v661_v18 = vpop.f32.mrf.mxu0 }
 0x17e   :  { %4965 = vst [vmem:[#allocation56_spill] sm:$0xff] %v4014_v43  ;;  %v774_v56 = vpop.f32.mrf.mxu1  ;;  %v662_v30 = vadd.f32 %v661_v18, %v3975_v50 }
 0x17f   :  { %v663_v47 = vpop.f32.mrf.mxu0 }
 0x180   :  { %v4021_v19 = vadd.f32 %v774_v56, %v662_v30  ;;  %v664_v38 = vadd.f32 %v663_v47, %v3978_v13  ;;  %v776_v34 = vpop.f32.mrf.mxu1  ;;  %v733_v56 = vadd.f32 %v3966_v0, %v620_v55  ;;  %v4969_v55 = vld [vmem:[#allocation5_spill] sm:$0xff] }
 0x182   :  { %4966 = vst [vmem:[#allocation57_spill] sm:$0xff] %v4021_v19  ;;  %v4025_v31 = vadd.f32 %v776_v34, %v664_v38  ;;  %v4993_v19 = vld [vmem:[#allocation29_spill] sm:$0xff] }
 0x183   :  { %v909_v41 = vpop.f32.mrf.mxu0 }
 0x184   :  { %4967 = vst [vmem:[#allocation58_spill] sm:$0xff] %v4025_v31  ;;  %v985_v43 = vadd.f32 %v909_v41, %v507_v42  ;;  %v980_v46 = vpop.f32.mrf.mxu1  ;;  %v4992_v31 = vld [vmem:[#allocation28_spill] sm:$0xff] }
 0x185   :  { %v911_v57 = vpop.f32.mrf.mxu0  ;;  %v987_v51 = vadd.f32 %v980_v46, %v733_v56  ;;  %v4970_v46 = vld [vmem:[#allocation6_spill] sm:$0xff]  ;;  %v4971_v56 = vld [vmem:[#allocation7_spill] sm:$0xff] }
 0x186   :  { %v2208_v37 = vmul.f32 -1.442695, %v985_v43  ;;  %v986_v18 = vadd.f32 %v911_v57, %v509_v35  ;;  %v982_v30 = vpop.f32.mrf.mxu1 }
 0x187   :  { %v2210_v47 = vmul.f32 -1.442695, %v987_v51  ;;  %v988_v43 = vadd.f32 %v982_v30, %v735_v49  ;;  %v4973_v51 = vld [vmem:[#allocation9_spill] sm:$0xff]  ;;  %v4974_v30 = vld [vmem:[#allocation10_spill] sm:$0xff]  ;;  %v4975_v49 = vld [vmem:[#allocation11_spill] sm:$0xff] }
 0x188   :  { %2233 = vpow2.f32 %v2208_v37  ;;  %v2209_v33 = vmul.f32 -1.442695, %v986_v18  ;;  %v4968_v18 = vld [vmem:[#allocation4_spill] sm:$0xff] }
 0x18a   :  { %2235 = vpow2.f32 %v2209_v33 }
 0x18b   :  { %2237 = vpow2.f32 %v2210_v47  ;;  %v4976_v47 = vld [vmem:[#allocation12_spill] sm:$0xff] }
 0x195   :  { %v2234_v25 = vpop.eup %2233 }
 0x196   :  { %v998_v38 = vadd.f32 1.0, %v2234_v25  ;;  %v4977_v25 = vld [vmem:[#allocation13_spill] sm:$0xff] }
 0x197   :  { %v2236_v34 = vpop.eup %2235 }
 0x198   :  { %2239 = vrcp.f32 %v998_v38  ;;  %v999_v42 = vadd.f32 1.0, %v2236_v34  ;;  %v2238_v45 = vpop.eup %2237  ;;  %v4979_v38 = vld [vmem:[#allocation15_spill] sm:$0xff]  ;;  %v4980_v34 = vld [vmem:[#allocation16_spill] sm:$0xff] }
 0x199   :  { %2241 = vtanh.f32 %v988_v43  ;;  %v1000_v41 = vadd.f32 1.0, %v2238_v45  ;;  %v4978_v43 = vld [vmem:[#allocation14_spill] sm:$0xff] }
 0x19a   :  { %2243 = vrcp.f32 %v999_v42  ;;  %v4981_v42 = vld [vmem:[#allocation17_spill] sm:$0xff]  ;;  %v4982_v45 = vld [vmem:[#allocation18_spill] sm:$0xff] }
 0x19b   :  { %2245 = vrcp.f32 %v1000_v41  ;;  %v4986_v41 = vld [vmem:[#allocation22_spill] sm:$0xff] }
 0x1a5   :  { %v2240_v50 = vpop.eup %2239 }
 0x1a6   :  { %v2242_v0 = vpop.eup %2241 }
 0x1a7   :  { %v2244_v33 = vpop.eup %2243  ;;  %v1009_v13 = vmul.f32 %v2242_v0, %v2240_v50  ;;  %v4983_v50 = vld [vmem:[#allocation19_spill] sm:$0xff]  ;;  %v4984_v0 = vld [vmem:[#allocation20_spill] sm:$0xff] }
 0x1a8   :  { %v1008_v60 = vmul.f32 0.0, %v2244_v33  ;;  %v2246_v53 = vpop.eup %2245  ;;  %v4985_v33 = vld [vmem:[#allocation21_spill] sm:$0xff] }
 0x1aa   :  { %v4034_v35 = vadd.f32 %v1009_v13, %v1008_v60  ;;  %v4987_v60 = vld [vmem:[#allocation23_spill] sm:$0xff]  ;;  %v4988_v13 = vld [vmem:[#allocation24_spill] sm:$0xff] }
 0x1ac   :  { %2247 = vtanh.f32 %v4034_v35 }
 0x1b9   :  { %v2248_v57 = vpop.eup %2247 }
 0x1ba   :  { %v1012_v37 = vmul.f32 %v2248_v57, %v2246_v53  ;;  %v4989_v53 = vld [vmem:[#allocation25_spill] sm:$0xff]  ;;  %v4990_v57 = vld [vmem:[#allocation26_spill] sm:$0xff] }
 0x1bc   :  { %1078 = vmatmul.mubr.f32.vlgmr.msra.gmra.mxu0 %v1012_v37  ;;  %1149 = vmatmul.mubr.f32.vlgmr.msra.gmra.mxu1 %v1012_v37  ;;  %v4991_v37 = vld [vmem:[#allocation27_spill] sm:$0xff] }
 0x1bd   :  { %1184 = vmatpush1.msra.mxu0 %v3426_v58  ;;  %1255 = vmatpush1.msra.mxu1 %v3431_v63 }
 0x1be   :  { %1185 = vmatprep.subr.mxu0 %v3438_v59  ;;  %1256 = vmatprep.subr.mxu1 %v3443_v2 }
 0x1bf   :  { %1186 = vmatpush1.msra.mxu0 %v3452_v1  ;;  %1257 = vmatpush1.msra.mxu1 %v3457_v5 }
 0x1c0   :  { %1187 = vmatprep.subr.mxu0 %v3466_v61  ;;  %1258 = vmatprep.subr.mxu1 %v3471_v62 }
 0x1c1   :  { %1188 = vmatpush1.msra.mxu0 %v3478_v12  ;;  %1259 = vmatpush1.msra.mxu1 %v3483_v16 }
 0x1c2   :  { %1189 = vmatprep.subr.mxu0 %v3490_v4  ;;  %1260 = vmatprep.subr.mxu1 %v3495_v6 }
 0x1c3   :  { %1190 = vmatpush1.msra.mxu0 %v3504_v15  ;;  %1261 = vmatpush1.msra.mxu1 %v3509_v20 }
 0x1c4   :  { %1191 = vmatprep.subr.mxu0 %v3518_v7  ;;  %1262 = vmatprep.subr.mxu1 %v3523_v9 }
 0x1c5   :  { %1192 = vmatpush1.msra.mxu0 %v3530_v24  ;;  %1263 = vmatpush1.msra.mxu1 %v3535_v28 }
 0x1c6   :  { %1193 = vmatprep.subr.mxu0 %v3542_v10  ;;  %1264 = vmatprep.subr.mxu1 %v3547_v11 }
 0x1c7   :  { %1194 = vmatpush1.msra.mxu0 %v3556_v27  ;;  %1265 = vmatpush1.msra.mxu1 %v3561_v32 }
 0x1c8   :  { %1195 = vmatprep.subr.mxu0 %v3570_v14  ;;  %1266 = vmatprep.subr.mxu1 %v3575_v17 }
 0x1c9   :  { %1196 = vmatpush1.msra.mxu0 %v3582_v36  ;;  %1267 = vmatpush1.msra.mxu1 %v3587_v40 }
 0x1ca   :  { %1197 = vmatprep.subr.mxu0 %v3594_v21  ;;  %1268 = vmatprep.subr.mxu1 %v3599_v22 }
 0x1cb   :  { %1198 = vmatpush1.msra.mxu0 %v3608_v39  ;;  %1269 = vmatpush1.msra.mxu1 %v3613_v44 }
 0x1cc   :  { %1199 = vmatprep.subr.mxu0 %v3622_v23  ;;  %1270 = vmatprep.subr.mxu1 %v3627_v26 }
 0x1cd   :  { %1200 = vmatpush1.msra.mxu0 %v3634_v48  ;;  %1271 = vmatpush1.msra.mxu1 %v3639_v52 }
 0x1ce   :  { %1201 = vmatprep.subr.mxu0 %v3646_v29  ;;  %1272 = vmatprep.subr.mxu1 %v4968_v18 }
 0x1cf   :  { %1202 = vmatpush1.msra.mxu0 %v4969_v55  ;;  %1273 = vmatpush1.msra.mxu1 %v4970_v46 }
 0x1d0   :  { %1203 = vmatprep.subr.mxu0 %v4971_v56  ;;  %1274 = vmatprep.subr.mxu1 %v4972_v54 }
 0x1d1   :  { %1204 = vmatpush1.msra.mxu0 %v4973_v51  ;;  %1275 = vmatpush1.msra.mxu1 %v4974_v30 }
 0x1d2   :  { %1205 = vmatprep.subr.mxu0 %v4975_v49  ;;  %1276 = vmatprep.subr.mxu1 %v4976_v47 }
 0x1d3   :  { %1206 = vmatpush1.msra.mxu0 %v4977_v25  ;;  %1277 = vmatpush1.msra.mxu1 %v4978_v43 }
 0x1d4   :  { %1207 = vmatprep.subr.mxu0 %v4979_v38  ;;  %1278 = vmatprep.subr.mxu1 %v4980_v34 }
 0x1d5   :  { %1208 = vmatpush1.msra.mxu0 %v4981_v42  ;;  %1279 = vmatpush1.msra.mxu1 %v4982_v45  ;;  %v5000_v45 = vld [vmem:[#allocation45_spill] sm:$0xff] }
 0x1d6   :  { %1209 = vmatprep.subr.mxu0 %v4983_v50  ;;  %1280 = vmatprep.subr.mxu1 %v4984_v0 }
 0x1d7   :  { %1210 = vmatpush1.msra.mxu0 %v4985_v33  ;;  %1281 = vmatpush1.msra.mxu1 %v4986_v41  ;;  %v4996_v41 = vld [vmem:[#allocation2_spill] sm:$0xff] }
 0x1d8   :  { %1211 = vmatprep.subr.mxu0 %v4987_v60  ;;  %1282 = vmatprep.subr.mxu1 %v4988_v13  ;;  %v4997_v60 = vld [vmem:[#allocation3_spill] sm:$0xff] }
 0x1d9   :  { %1212 = vmatpush1.msra.mxu0 %v4989_v53  ;;  %1283 = vmatpush1.msra.mxu1 %v4990_v57  ;;  %v4998_v53 = vld [vmem:[#allocation31_spill] sm:$0xff] }
 0x1da   :  { %1213 = vmatprep.subr.mxu0 %v4991_v37  ;;  %1284 = vmatprep.subr.mxu1 %v4992_v31  ;;  %v4999_v37 = vld [vmem:[#allocation32_spill] sm:$0xff] }
 0x1db   :  { %1214 = vmatpush1.msra.mxu0 %v4993_v19  ;;  %1247 = vmatprep.mubr.f32.mxu0 %v4994_v3 }
 0x1dc   :  { %1285 = vmatpush1.msra.mxu1 %v4995_v8  ;;  %1318 = vmatprep.mubr.f32.mxu1 %v4994_v3  ;;  %v5001_v3 = vld [vmem:[#allocation46_spill] sm:$0xff] }
 0x1dd   :  { %1353 = vmatprep.subr.mxu0 %v4996_v41  ;;  %1424 = vmatprep.subr.mxu1 %v4997_v60 }
 0x27c   :  { %v1079_v13 = vpop.f32.mrf.mxu0  ;;  %v1150_v19 = vpop.f32.mrf.mxu1 }
 0x27d   :  { %v1155_v33 = vadd.f32 %v1079_v13, %v4998_v53  ;;  %v1157_v42 = vadd.f32 %v1150_v19, %v5000_v45 }
 0x27e   :  { %v1081_v57 = vpop.f32.mrf.mxu0  ;;  %v1152_v8 = vpop.f32.mrf.mxu1 }
 0x27f   :  { %v2211_v0 = vmul.f32 -1.442695, %v1155_v33  ;;  %v1156_v50 = vadd.f32 %v1081_v57, %v4999_v37  ;;  %v2213_v34 = vmul.f32 -1.442695, %v1157_v42  ;;  %v1158_v38 = vadd.f32 %v1152_v8, %v5001_v3 }
 0x281   :  { %2249 = vpow2.f32 %v2211_v0  ;;  %v2212_v31 = vmul.f32 -1.442695, %v1156_v50 }
 0x283   :  { %2251 = vpow2.f32 %v2212_v31 }
 0x284   :  { %2253 = vpow2.f32 %v2213_v34 }
 0x285   :  { %2255 = vtanh.f32 %v1158_v38 }
 0x28e   :  { %v2250_v41 = vpop.eup %2249 }
 0x28f   :  { %v1168_v43 = vadd.f32 1.0, %v2250_v41  ;;  %v4198_v41 = vld [vmem:[%s4805_s2 + $0x1e0] sm:$0xff] }
 0x290   :  { %v2252_v60 = vpop.eup %2251 }
 0x291   :  { %2257 = vrcp.f32 %v1168_v43  ;;  %v1169_v13 = vadd.f32 1.0, %v2252_v60  ;;  %v2254_v33 = vpop.eup %2253  ;;  %v4204_v60 = vld [vmem:[%s4805_s2 + $0x1f0] sm:$0xff] }
 0x292   :  { %v2256_v53 = vpop.eup %2255  ;;  %v1170_v57 = vadd.f32 1.0, %v2254_v33  ;;  %v4216_v33 = vld [vmem:[%s4805_s2 + $0x1d8] sm:$0xff] }
 0x293   :  { %2259 = vrcp.f32 %v1169_v13  ;;  %v4210_v13 = vld [vmem:[%s4805_s2 + $0x1c8] sm:$0xff] }
 0x294   :  { %2261 = vrcp.f32 %v1170_v57  ;;  %v4246_v57 = vld [vmem:[%s4805_s2 + $0x1a0] sm:$0xff] }
 0x29e   :  { %v2258_v0 = vpop.eup %2257 }
 0x29f   :  { %v1179_v50 = vmul.f32 %v2258_v0, %v2256_v53  ;;  %v4222_v53 = vld [vmem:[%s4805_s2 + $0x1c0] sm:$0xff]  ;;  %v4228_v0 = vld [vmem:[%s4805_s2 + $0x1d0] sm:$0xff] }
 0x2a0   :  { %v2260_v31 = vpop.eup %2259 }
 0x2a1   :  { %v1178_v19 = vmul.f32 %v2260_v31, %v4034_v35  ;;  %v2262_v3 = vpop.eup %2261  ;;  %v4240_v31 = vld [vmem:[%s4805_s2 + $0x1b8] sm:$0xff] }
 0x2a3   :  { %v4108_v45 = vadd.f32 %v1179_v50, %v1178_v19  ;;  %v4234_v50 = vld [vmem:[%s4805_s2 + $0x1a8] sm:$0xff]  ;;  %v4252_v19 = vld [vmem:[%s4805_s2 + $0x1b0] sm:$0xff] }
 0x2a5   :  { %2263 = vtanh.f32 %v4108_v45 }
 0x2b2   :  { %v2264_v8 = vpop.eup %2263 }
 0x2b3   :  { %v1182_v34 = vmul.f32 %v2264_v8, %v2262_v3  ;;  %v4264_v3 = vld [vmem:[%s4805_s2 + $0x198] sm:$0xff]  ;;  %v4270_v8 = vld [vmem:[%s4805_s2 + $0x180] sm:$0xff] }
 0x2b5   :  { %1248 = vmatmul.mubr.f32.vlgmr.msra.gmra.mxu0 %v1182_v34  ;;  %1319 = vmatmul.mubr.f32.vlgmr.msra.gmra.mxu1 %v1182_v34  ;;  %v4276_v34 = vld [vmem:[%s4805_s2 + $0x190] sm:$0xff] }
 0x2b6   :  { %1354 = vmatpush1.msra.mxu0 %v3426_v58  ;;  %1425 = vmatpush1.msra.mxu1 %v3431_v63  ;;  %v5002_v58 = vld [vmem:[#allocation14_spill] sm:$0xff]  ;;  %v5003_v63 = vld [vmem:[#allocation15_spill] sm:$0xff] }
 0x2b7   :  { %1355 = vmatprep.subr.mxu0 %v3438_v59  ;;  %1426 = vmatprep.subr.mxu1 %v3443_v2  ;;  %v5004_v59 = vld [vmem:[#allocation16_spill] sm:$0xff]  ;;  %v5005_v2 = vld [vmem:[#allocation17_spill] sm:$0xff] }
 0x2b8   :  { %1356 = vmatpush1.msra.mxu0 %v3452_v1  ;;  %1427 = vmatpush1.msra.mxu1 %v3457_v5  ;;  %v5006_v1 = vld [vmem:[#allocation18_spill] sm:$0xff]  ;;  %v5007_v5 = vld [vmem:[#allocation19_spill] sm:$0xff] }
 0x2b9   :  { %1357 = vmatprep.subr.mxu0 %v3466_v61  ;;  %1428 = vmatprep.subr.mxu1 %v3471_v62  ;;  %v5008_v61 = vld [vmem:[#allocation20_spill] sm:$0xff]  ;;  %v5009_v62 = vld [vmem:[#allocation21_spill] sm:$0xff] }
 0x2ba   :  { %1358 = vmatpush1.msra.mxu0 %v3478_v12  ;;  %1429 = vmatpush1.msra.mxu1 %v3483_v16  ;;  %v5010_v12 = vld [vmem:[#allocation22_spill] sm:$0xff]  ;;  %v5011_v16 = vld [vmem:[#allocation23_spill] sm:$0xff] }
 0x2bb   :  { %1359 = vmatprep.subr.mxu0 %v3490_v4  ;;  %1430 = vmatprep.subr.mxu1 %v3495_v6  ;;  %v5012_v4 = vld [vmem:[#allocation24_spill] sm:$0xff]  ;;  %v5013_v6 = vld [vmem:[#allocation25_spill] sm:$0xff] }
 0x2bc   :  { %1360 = vmatpush1.msra.mxu0 %v3504_v15  ;;  %1431 = vmatpush1.msra.mxu1 %v3509_v20  ;;  %v5014_v15 = vld [vmem:[#allocation26_spill] sm:$0xff]  ;;  %v5015_v20 = vld [vmem:[#allocation27_spill] sm:$0xff] }
 0x2bd   :  { %1361 = vmatprep.subr.mxu0 %v3518_v7  ;;  %1432 = vmatprep.subr.mxu1 %v3523_v9  ;;  %v5016_v7 = vld [vmem:[#allocation28_spill] sm:$0xff]  ;;  %v5017_v9 = vld [vmem:[#allocation29_spill] sm:$0xff] }
 0x2be   :  { %1362 = vmatpush1.msra.mxu0 %v3530_v24  ;;  %1433 = vmatpush1.msra.mxu1 %v3535_v28  ;;  %v5018_v24 = vmov 0.0   ;;  %v5019_v28 = vld [vmem:[#allocation30_spill] sm:$0xff] }
 0x2bf   :  { %1363 = vmatprep.subr.mxu0 %v3542_v10  ;;  %1434 = vmatprep.subr.mxu1 %v3547_v11  ;;  %v4178_v10 = vld [vmem:[%s4805_s2 + $0x1e8] sm:$0xff]  ;;  %v4184_v11 = vld [vmem:[%s4805_s2 + $0x1f8] sm:$0xff] }
 0x2c0   :  { %1364 = vmatpush1.msra.mxu0 %v3556_v27  ;;  %1435 = vmatpush1.msra.mxu1 %v3561_v32  ;;  %5020 = vst [vmem:[#allocation4_spill] sm:$0xff] %v4178_v10  ;;  %5021 = vst [vmem:[#allocation5_spill] sm:$0xff] %v4184_v11  ;;  %v5022_v32 = vld [vmem:[#allocation33_spill] sm:$0xff] }
 0x2c1   :  { %1365 = vmatprep.subr.mxu0 %v3570_v14  ;;  %1436 = vmatprep.subr.mxu1 %v3575_v17 }
 0x2c2   :  { %1366 = vmatpush1.msra.mxu0 %v3582_v36  ;;  %1437 = vmatpush1.msra.mxu1 %v3587_v40  ;;  %v5023_v40 = vld [vmem:[#allocation34_spill] sm:$0xff] }
 0x2c3   :  { %1367 = vmatprep.subr.mxu0 %v3594_v21  ;;  %1438 = vmatprep.subr.mxu1 %v3599_v22 }
 0x2c4   :  { %1368 = vmatpush1.msra.mxu0 %v3608_v39  ;;  %1439 = vmatpush1.msra.mxu1 %v3613_v44  ;;  %v5024_v44 = vld [vmem:[#allocation47_spill] sm:$0xff] }
 0x2c5   :  { %1369 = vmatprep.subr.mxu0 %v3622_v23  ;;  %1440 = vmatprep.subr.mxu1 %v3627_v26 }
 0x2c6   :  { %1370 = vmatpush1.msra.mxu0 %v3634_v48  ;;  %1441 = vmatpush1.msra.mxu1 %v3639_v52  ;;  %v5025_v52 = vld [vmem:[#allocation48_spill] sm:$0xff] }
 0x2c7   :  { %1371 = vmatprep.subr.mxu0 %v3646_v29  ;;  %1442 = vmatprep.subr.mxu1 %v4968_v18 }
 0x2c8   :  { %1372 = vmatpush1.msra.mxu0 %v4969_v55  ;;  %1443 = vmatpush1.msra.mxu1 %v4970_v46 }
 0x2c9   :  { %1373 = vmatprep.subr.mxu0 %v4971_v56  ;;  %1444 = vmatprep.subr.mxu1 %v4972_v54 }
 0x2ca   :  { %1374 = vmatpush1.msra.mxu0 %v4973_v51  ;;  %1445 = vmatpush1.msra.mxu1 %v4974_v30 }
 0x2cb   :  { %1375 = vmatprep.subr.mxu0 %v4975_v49  ;;  %1446 = vmatprep.subr.mxu1 %v4976_v47 }
 0x2cc   :  { %1376 = vmatpush1.msra.mxu0 %v4977_v25  ;;  %1447 = vmatpush1.msra.mxu1 %v5002_v58  ;;  %v4282_v58 = vld [vmem:[%s4805_s2 + $0x168] sm:$0xff] }
 0x2cd   :  { %1377 = vmatprep.subr.mxu0 %v5003_v63  ;;  %1448 = vmatprep.subr.mxu1 %v5004_v59  ;;  %v4288_v63 = vld [vmem:[%s4805_s2 + $0x178] sm:$0xff]  ;;  %v4294_v59 = vld [vmem:[%s4805_s2 + $0x160] sm:$0xff] }
 0x2ce   :  { %1378 = vmatpush1.msra.mxu0 %v5005_v2  ;;  %1449 = vmatpush1.msra.mxu1 %v5006_v1  ;;  %v4300_v2 = vld [vmem:[%s4805_s2 + $0x170] sm:$0xff]  ;;  %v4306_v1 = vld [vmem:[%s4805_s2 + $0x148] sm:$0xff] }
 0x2cf   :  { %1379 = vmatprep.subr.mxu0 %v5007_v5  ;;  %1450 = vmatprep.subr.mxu1 %v5008_v61  ;;  %v4312_v5 = vld [vmem:[%s4805_s2 + $0x158] sm:$0xff]  ;;  %v4318_v61 = vld [vmem:[%s4805_s2 + $0x140] sm:$0xff] }
 0x2d0   :  { %1380 = vmatpush1.msra.mxu0 %v5009_v62  ;;  %1451 = vmatpush1.msra.mxu1 %v5010_v12  ;;  %v4324_v62 = vld [vmem:[%s4805_s2 + $0x150] sm:$0xff]  ;;  %v4330_v12 = vld [vmem:[%s4805_s2 + $0x128] sm:$0xff] }
 0x2d1   :  { %1381 = vmatprep.subr.mxu0 %v5011_v16  ;;  %1452 = vmatprep.subr.mxu1 %v5012_v4  ;;  %v4336_v16 = vld [vmem:[%s4805_s2 + $0x138] sm:$0xff]  ;;  %v4342_v4 = vld [vmem:[%s4805_s2 + $0x120] sm:$0xff] }
 0x2d2   :  { %1382 = vmatpush1.msra.mxu0 %v5013_v6  ;;  %1453 = vmatpush1.msra.mxu1 %v5014_v15  ;;  %v4348_v6 = vld [vmem:[%s4805_s2 + $0x130] sm:$0xff]  ;;  %v4354_v15 = vld [vmem:[%s4805_s2 + $0x108] sm:$0xff] }
 0x2d3   :  { %1383 = vmatprep.subr.mxu0 %v5015_v20  ;;  %1454 = vmatprep.subr.mxu1 %v5016_v7  ;;  %v4360_v20 = vld [vmem:[%s4805_s2 + $0x118] sm:$0xff]  ;;  %v4366_v7 = vld [vmem:[%s4805_s2 + $0x100] sm:$0xff] }
 0x2d4   :  { %1384 = vmatpush1.msra.mxu0 %v5017_v9  ;;  %1417 = vmatprep.mubr.f32.mxu0 %v5018_v24  ;;  %v4372_v9 = vld [vmem:[%s4805_s2 + $0x110] sm:$0xff] }
 0x2d5   :  { %1455 = vmatpush1.msra.mxu1 %v5019_v28  ;;  %1488 = vmatprep.mubr.f32.mxu1 %v5018_v24  ;;  %v4378_v28 = vld [vmem:[%s4805_s2 + $0xe8] sm:$0xff] }
 0x2d6   :  { %1523 = vmatprep.subr.mxu0 %v4178_v10  ;;  %1594 = vmatprep.subr.mxu1 %v4184_v11 }
 0x375   :  { %v1249_v27 = vpop.f32.mrf.mxu0  ;;  %v1320_v39 = vpop.f32.mrf.mxu1 }
 0x376   :  { %v1325_v14 = vadd.f32 %v1249_v27, %v5022_v32  ;;  %v1327_v23 = vadd.f32 %v1320_v39, %v5024_v44  ;;  %v4384_v27 = vld [vmem:[%s4805_s2 + $0xf8] sm:$0xff]  ;;  %v4390_v32 = vld [vmem:[%s4805_s2 + $0xe0] sm:$0xff] }
 0x377   :  { %v1251_v17 = vpop.f32.mrf.mxu0  ;;  %v1322_v26 = vpop.f32.mrf.mxu1  ;;  %v4432_v39 = vld [vmem:[%s4805_s2 + $0xb8] sm:$0xff]  ;;  %v4438_v44 = vld [vmem:[%s4805_s2 + $0xa0] sm:$0xff] }
 0x378   :  { %v2214_v36 = vmul.f32 -1.442695, %v1325_v14  ;;  %v1326_v21 = vadd.f32 %v1251_v17, %v5023_v40  ;;  %v2216_v48 = vmul.f32 -1.442695, %v1327_v23  ;;  %v1328_v29 = vadd.f32 %v1322_v26, %v5025_v52  ;;  %v4396_v14 = vld [vmem:[%s4805_s2 + $0xf0] sm:$0xff]  ;;  %v4402_v17 = vld [vmem:[%s4805_s2 + $0xc8] sm:$0xff] }
 0x379   :  { %v4414_v40 = vld [vmem:[%s4805_s2 + $0xc0] sm:$0xff]  ;;  %v4444_v23 = vld [vmem:[%s4805_s2 + $0xb0] sm:$0xff]  ;;  %v4450_v26 = vld [vmem:[%s4805_s2 + $0x88] sm:$0xff] }
 0x37a   :  { %2265 = vpow2.f32 %v2214_v36  ;;  %v2215_v22 = vmul.f32 -1.442695, %v1326_v21  ;;  %v4408_v36 = vld [vmem:[%s4805_s2 + $0xd8] sm:$0xff]  ;;  %v4420_v21 = vld [vmem:[%s4805_s2 + $0xd0] sm:$0xff]  ;;  %v4462_v52 = vld [vmem:[%s4805_s2 + $0x80] sm:$0xff] }
 0x37c   :  { %2267 = vpow2.f32 %v2215_v22  ;;  %v4426_v22 = vld [vmem:[%s4805_s2 + $0xa8] sm:$0xff] }
 0x37d   :  { %2269 = vpow2.f32 %v2216_v48  ;;  %v4456_v48 = vld [vmem:[%s4805_s2 + $0x98] sm:$0xff] }
 0x37e   :  { %2271 = vtanh.f32 %v1328_v29  ;;  %v4468_v29 = vld [vmem:[%s4805_s2 + $0x90] sm:$0xff] }
 0x37f   :  { %5026 = vst [vmem:[#allocation6_spill] sm:$0xff] %v4468_v29 }
 0x387   :  { %v2266_v35 = vpop.eup %2265 }
 0x388   :  { %v1338_v18 = vadd.f32 1.0, %v2266_v35  ;;  %v4474_v35 = vld [vmem:[%s4805_s2 + $0x68] sm:$0xff] }
 0x389   :  { %v2268_v55 = vpop.eup %2267  ;;  %5027 = vst [vmem:[#allocation7_spill] sm:$0xff] %v4474_v35 }
 0x38a   :  { %2273 = vrcp.f32 %v1338_v18  ;;  %v1339_v46 = vadd.f32 1.0, %v2268_v55  ;;  %v2270_v56 = vpop.eup %2269  ;;  %v4480_v18 = vld [vmem:[%s4805_s2 + $0x78] sm:$0xff]  ;;  %v4486_v55 = vld [vmem:[%s4805_s2 + $0x60] sm:$0xff] }
 0x38b   :  { %v2272_v54 = vpop.eup %2271  ;;  %v1340_v47 = vadd.f32 1.0, %v2270_v56  ;;  %5028 = vst [vmem:[#allocation8_spill] sm:$0xff] %v4480_v18  ;;  %5029 = vst [vmem:[#allocation9_spill] sm:$0xff] %v4486_v55  ;;  %v4498_v56 = vld [vmem:[%s4805_s2 + $0x48] sm:$0xff] }
 0x38c   :  { %2275 = vrcp.f32 %v1339_v46  ;;  %v4492_v46 = vld [vmem:[%s4805_s2 + $0x70] sm:$0xff]  ;;  %5031 = vst [vmem:[#allocation11_spill] sm:$0xff] %v4498_v56 }
 0x38d   :  { %2277 = vrcp.f32 %v1340_v47  ;;  %5030 = vst [vmem:[#allocation10_spill] sm:$0xff] %v4492_v46  ;;  %v4528_v47 = vld [vmem:[%s4805_s2 + $0x38] sm:$0xff] }
 0x38e   :  { %5036 = vst [vmem:[#allocation31_spill] sm:$0xff] %v4528_v47 }
 0x397   :  { %v2274_v51 = vpop.eup %2273 }
 0x398   :  { %v1349_v30 = vmul.f32 %v2274_v51, %v2272_v54  ;;  %v4504_v54 = vld [vmem:[%s4805_s2 + $0x58] sm:$0xff]  ;;  %v4510_v51 = vld [vmem:[%s4805_s2 + $0x40] sm:$0xff] }
 0x399   :  { %v2276_v49 = vpop.eup %2275  ;;  %5032 = vst [vmem:[#allocation12_spill] sm:$0xff] %v4504_v54  ;;  %5033 = vst [vmem:[#allocation13_spill] sm:$0xff] %v4510_v51 }
 0x39a   :  { %v1348_v25 = vmul.f32 %v2276_v49, %v4108_v45  ;;  %v2278_v38 = vpop.eup %2277  ;;  %v4258_v45 = vld [vmem:[%s4805_s2 + $0x188] sm:$0xff] }
 0x39b   :  { %v4522_v49 = vld [vmem:[%s4805_s2 + $0x28] sm:$0xff] }
 0x39c   :  { %v4192_v43 = vadd.f32 %v1349_v30, %v1348_v25  ;;  %v4516_v30 = vld [vmem:[%s4805_s2 + $0x50] sm:$0xff]  ;;  %5035 = vst [vmem:[#allocation3_spill] sm:$0xff] %v4522_v49  ;;  %v4534_v25 = vld [vmem:[%s4805_s2 + $0x20] sm:$0xff] }
 0x39d   :  { %5034 = vst [vmem:[#allocation2_spill] sm:$0xff] %v4516_v30  ;;  %5037 = vst [vmem:[#allocation32_spill] sm:$0xff] %v4534_v25 }
 0x39e   :  { %2279 = vtanh.f32 %v4192_v43 }
 0x3ab   :  { %v2280_v42 = vpop.eup %2279 }
 0x3ac   :  { %v1352_v37 = vmul.f32 %v2280_v42, %v2278_v38  ;;  %v4540_v38 = vld [vmem:[%s4805_s2 + $0x30] sm:$0xff]  ;;  %v4546_v42 = vld [vmem:[%s4805_s2 + $0x8] sm:$0xff] }
 0x3ad   :  { %5038 = vst [vmem:[#allocation45_spill] sm:$0xff] %v4540_v38  ;;  %5039 = vst [vmem:[#allocation46_spill] sm:$0xff] %v4546_v42 }
 0x3ae   :  { %1418 = vmatmul.mubr.f32.vlgmr.msra.gmra.mxu0 %v1352_v37  ;;  %1489 = vmatmul.mubr.f32.vlgmr.msra.gmra.mxu1 %v1352_v37  ;;  %v4552_v37 = vld [vmem:[%s4805_s2 + $0x18] sm:$0xff] }
 0x3af   :  { %1524 = vmatpush1.msra.mxu0 %v4198_v41  ;;  %1595 = vmatpush1.msra.mxu1 %v4204_v60  ;;  %5040 = vst [vmem:[#allocation14_spill] sm:$0xff] %v4552_v37 }
 0x3b0   :  { %1525 = vmatprep.subr.mxu0 %v4210_v13  ;;  %1596 = vmatprep.subr.mxu1 %v4216_v33 }
 0x3b1   :  { %1526 = vmatpush1.msra.mxu0 %v4222_v53  ;;  %1597 = vmatpush1.msra.mxu1 %v4228_v0 }
 0x3b2   :  { %1527 = vmatprep.subr.mxu0 %v4234_v50  ;;  %1598 = vmatprep.subr.mxu1 %v4240_v31 }
 0x3b3   :  { %1528 = vmatpush1.msra.mxu0 %v4246_v57  ;;  %1599 = vmatpush1.msra.mxu1 %v4252_v19 }
 0x3b4   :  { %1529 = vmatprep.subr.mxu0 %v4258_v45  ;;  %1600 = vmatprep.subr.mxu1 %v4264_v3 }
 0x3b5   :  { %1530 = vmatpush1.msra.mxu0 %v4270_v8  ;;  %1601 = vmatpush1.msra.mxu1 %v4276_v34 }
 0x3b6   :  { %1531 = vmatprep.subr.mxu0 %v4282_v58  ;;  %1602 = vmatprep.subr.mxu1 %v4288_v63 }
 0x3b7   :  { %1532 = vmatpush1.msra.mxu0 %v4294_v59  ;;  %1603 = vmatpush1.msra.mxu1 %v4300_v2 }
 0x3b8   :  { %1533 = vmatprep.subr.mxu0 %v4306_v1  ;;  %1604 = vmatprep.subr.mxu1 %v4312_v5 }
 0x3b9   :  { %1534 = vmatpush1.msra.mxu0 %v4318_v61  ;;  %1605 = vmatpush1.msra.mxu1 %v4324_v62 }
 0x3ba   :  { %1535 = vmatprep.subr.mxu0 %v4330_v12  ;;  %1606 = vmatprep.subr.mxu1 %v4336_v16 }
 0x3bb   :  { %1536 = vmatpush1.msra.mxu0 %v4342_v4  ;;  %1607 = vmatpush1.msra.mxu1 %v4348_v6 }
 0x3bc   :  { %1537 = vmatprep.subr.mxu0 %v4354_v15  ;;  %1608 = vmatprep.subr.mxu1 %v4360_v20 }
 0x3bd   :  { %1538 = vmatpush1.msra.mxu0 %v4366_v7  ;;  %1609 = vmatpush1.msra.mxu1 %v4372_v9 }
 0x3be   :  { %1539 = vmatprep.subr.mxu0 %v4378_v28  ;;  %1610 = vmatprep.subr.mxu1 %v4384_v27 }
 0x3bf   :  { %1540 = vmatpush1.msra.mxu0 %v4390_v32  ;;  %1611 = vmatpush1.msra.mxu1 %v4396_v14 }
 0x3c0   :  { %1541 = vmatprep.subr.mxu0 %v4402_v17  ;;  %1612 = vmatprep.subr.mxu1 %v4408_v36 }
 0x3c1   :  { %1542 = vmatpush1.msra.mxu0 %v4414_v40  ;;  %1613 = vmatpush1.msra.mxu1 %v4420_v21 }
 0x3c2   :  { %1543 = vmatprep.subr.mxu0 %v4426_v22  ;;  %1614 = vmatprep.subr.mxu1 %v4432_v39 }
 0x3c3   :  { %1544 = vmatpush1.msra.mxu0 %v4438_v44  ;;  %1615 = vmatpush1.msra.mxu1 %v4444_v23 }
 0x3c4   :  { %1545 = vmatprep.subr.mxu0 %v4450_v26  ;;  %1616 = vmatprep.subr.mxu1 %v4456_v48 }
 0x3c5   :  { %1546 = vmatpush1.msra.mxu0 %v4462_v52  ;;  %1617 = vmatpush1.msra.mxu1 %v4468_v29 }
 0x3c6   :  { %1547 = vmatprep.subr.mxu0 %v4474_v35  ;;  %1618 = vmatprep.subr.mxu1 %v4480_v18 }
 0x3c7   :  { %1548 = vmatpush1.msra.mxu0 %v4486_v55  ;;  %1619 = vmatpush1.msra.mxu1 %v4492_v46  ;;  %v5045_v46 = vld [vmem:[#allocation49_spill] sm:$0xff] }
 0x3c8   :  { %1549 = vmatprep.subr.mxu0 %v4498_v56  ;;  %1620 = vmatprep.subr.mxu1 %v4504_v54 }
 0x3c9   :  { %1550 = vmatpush1.msra.mxu0 %v4510_v51  ;;  %1621 = vmatpush1.msra.mxu1 %v4516_v30  ;;  %v5044_v30 = vld [vmem:[#allocation36_spill] sm:$0xff] }
 0x3ca   :  { %1551 = vmatprep.subr.mxu0 %v4522_v49  ;;  %1622 = vmatprep.subr.mxu1 %v4528_v47 }
 0x3cb   :  { %1552 = vmatpush1.msra.mxu0 %v4534_v25  ;;  %1623 = vmatpush1.msra.mxu1 %v4540_v38  ;;  %v4558_v25 = vld [vmem:[%s4805_s2] sm:$0xff]  ;;  %v5043_v38 = vld [vmem:[#allocation35_spill] sm:$0xff] }
 0x3cc   :  { %1553 = vmatprep.subr.mxu0 %v4546_v42  ;;  %1624 = vmatprep.subr.mxu1 %v4552_v37  ;;  %5041 = vst [vmem:[#allocation15_spill] sm:$0xff] %v4558_v25  ;;  %v4565_v42 = vld [vmem:[%s4805_s2 + $0x10] sm:$0xff] }
 0x3cd   :  { %1554 = vmatpush1.msra.mxu0 %v4558_v25  ;;  %1587 = vmatprep.mubr.f32.mxu0 %v5018_v24  ;;  %5042 = vst [vmem:[#allocation16_spill] sm:$0xff] %v4565_v42 }
 0x3ce   :  { %1625 = vmatpush1.msra.mxu1 %v4565_v42  ;;  %1658 = vmatprep.mubr.f32.mxu1 %v5018_v24  ;;  %v5046_v24 = vld [vmem:[#allocation50_spill] sm:$0xff] }
 0x3cf   :  { %1693 = vmatprep.subr.mxu0 %v4178_v10  ;;  %1764 = vmatprep.subr.mxu1 %v4184_v11 }
 0x46e   :  { %v1419_v37 = vpop.f32.mrf.mxu0  ;;  %v1490_v56 = vpop.f32.mrf.mxu1 }
 0x46f   :  { %v1495_v47 = vadd.f32 %v1419_v37, %v5043_v38  ;;  %v1497_v55 = vadd.f32 %v1490_v56, %v5045_v46  ;;  %v5053_v37 = vld [vmem:[#allocation12_spill] sm:$0xff] }
 0x470   :  { %v1421_v49 = vpop.f32.mrf.mxu0  ;;  %v1492_v42 = vpop.f32.mrf.mxu1 }
 0x471   :  { %v2217_v25 = vmul.f32 -1.442695, %v1495_v47  ;;  %v1496_v51 = vadd.f32 %v1421_v49, %v5044_v30  ;;  %v2219_v18 = vmul.f32 -1.442695, %v1497_v55  ;;  %v1498_v35 = vadd.f32 %v1492_v42, %v5046_v24  ;;  %v5051_v55 = vld [vmem:[#allocation10_spill] sm:$0xff]  ;;  %v5052_v42 = vld [vmem:[#allocation11_spill] sm:$0xff] }
 0x473   :  { %2281 = vpow2.f32 %v2217_v25  ;;  %v2218_v54 = vmul.f32 -1.442695, %v1496_v51 }
 0x475   :  { %2283 = vpow2.f32 %v2218_v54 }
 0x476   :  { %2285 = vpow2.f32 %v2219_v18 }
 0x477   :  { %2287 = vtanh.f32 %v1498_v35  ;;  %v5050_v35 = vld [vmem:[#allocation9_spill] sm:$0xff] }
 0x480   :  { %v2282_v10 = vpop.eup %2281 }
 0x481   :  { %v1508_v29 = vadd.f32 1.0, %v2282_v10 }
 0x482   :  { %v2284_v11 = vpop.eup %2283 }
 0x483   :  { %2289 = vrcp.f32 %v1508_v29  ;;  %v1509_v38 = vadd.f32 1.0, %v2284_v11  ;;  %v2286_v47 = vpop.eup %2285  ;;  %v5047_v11 = vld [vmem:[#allocation6_spill] sm:$0xff]  ;;  %v5049_v29 = vld [vmem:[#allocation8_spill] sm:$0xff] }
 0x484   :  { %v2288_v30 = vpop.eup %2287  ;;  %v1510_v25 = vadd.f32 1.0, %v2286_v47  ;;  %v5055_v47 = vld [vmem:[#allocation2_spill] sm:$0xff] }
 0x485   :  { %2291 = vrcp.f32 %v1509_v38  ;;  %v5054_v38 = vld [vmem:[#allocation13_spill] sm:$0xff] }
 0x486   :  { %2293 = vrcp.f32 %v1510_v25  ;;  %v5060_v25 = vld [vmem:[#allocation46_spill] sm:$0xff] }
 0x490   :  { %v2290_v49 = vpop.eup %2289 }
 0x491   :  { %v1519_v51 = vmul.f32 %v2290_v49, %v2288_v30  ;;  %v5056_v30 = vld [vmem:[#allocation3_spill] sm:$0xff] }
 0x492   :  { %v2292_v54 = vpop.eup %2291  ;;  %v5057_v49 = vld [vmem:[#allocation31_spill] sm:$0xff] }
 0x493   :  { %v1518_v46 = vmul.f32 %v2292_v54, %v4192_v43  ;;  %v2294_v24 = vpop.eup %2293  ;;  %v5048_v43 = vld [vmem:[#allocation7_spill] sm:$0xff]  ;;  %v5059_v54 = vld [vmem:[#allocation45_spill] sm:$0xff] }
 0x495   :  { %v4576_v56 = vadd.f32 %v1519_v51, %v1518_v46  ;;  %v5058_v51 = vld [vmem:[#allocation32_spill] sm:$0xff]  ;;  %v5061_v46 = vld [vmem:[#allocation14_spill] sm:$0xff] }
 0x497   :  { %2295 = vtanh.f32 %v4576_v56 }
 0x4a4   :  { %v2296_v10 = vpop.eup %2295 }
 0x4a5   :  { %v1522_v18 = vmul.f32 %v2296_v10, %v2294_v24  ;;  %v5062_v24 = vld [vmem:[#allocation15_spill] sm:$0xff]  ;;  %v5063_v10 = vmov 0.0  }
 0x4a7   :  { %1588 = vmatmul.mubr.f32.vlgmr.msra.gmra.mxu0 %v1522_v18  ;;  %1659 = vmatmul.mubr.f32.vlgmr.msra.gmra.mxu1 %v1522_v18  ;;  %v5064_v18 = vld [vmem:[#allocation16_spill] sm:$0xff] }
 0x4a8   :  { %1694 = vmatpush1.msra.mxu0 %v4198_v41  ;;  %1765 = vmatpush1.msra.mxu1 %v4204_v60 }
 0x4a9   :  { %1695 = vmatprep.subr.mxu0 %v4210_v13  ;;  %1766 = vmatprep.subr.mxu1 %v4216_v33 }
 0x4aa   :  { %1696 = vmatpush1.msra.mxu0 %v4222_v53  ;;  %1767 = vmatpush1.msra.mxu1 %v4228_v0 }
 0x4ab   :  { %1697 = vmatprep.subr.mxu0 %v4234_v50  ;;  %1768 = vmatprep.subr.mxu1 %v4240_v31 }
 0x4ac   :  { %1698 = vmatpush1.msra.mxu0 %v4246_v57  ;;  %1769 = vmatpush1.msra.mxu1 %v4252_v19 }
 0x4ad   :  { %1699 = vmatprep.subr.mxu0 %v4258_v45  ;;  %1770 = vmatprep.subr.mxu1 %v4264_v3 }
 0x4ae   :  { %1700 = vmatpush1.msra.mxu0 %v4270_v8  ;;  %1771 = vmatpush1.msra.mxu1 %v4276_v34 }
 0x4af   :  { %1701 = vmatprep.subr.mxu0 %v4282_v58  ;;  %1772 = vmatprep.subr.mxu1 %v4288_v63 }
 0x4b0   :  { %1702 = vmatpush1.msra.mxu0 %v4294_v59  ;;  %1773 = vmatpush1.msra.mxu1 %v4300_v2 }
 0x4b1   :  { %1703 = vmatprep.subr.mxu0 %v4306_v1  ;;  %1774 = vmatprep.subr.mxu1 %v4312_v5 }
 0x4b2   :  { %1704 = vmatpush1.msra.mxu0 %v4318_v61  ;;  %1775 = vmatpush1.msra.mxu1 %v4324_v62 }
 0x4b3   :  { %1705 = vmatprep.subr.mxu0 %v4330_v12  ;;  %1776 = vmatprep.subr.mxu1 %v4336_v16 }
 0x4b4   :  { %1706 = vmatpush1.msra.mxu0 %v4342_v4  ;;  %1777 = vmatpush1.msra.mxu1 %v4348_v6 }
 0x4b5   :  { %1707 = vmatprep.subr.mxu0 %v4354_v15  ;;  %1778 = vmatprep.subr.mxu1 %v4360_v20 }
 0x4b6   :  { %1708 = vmatpush1.msra.mxu0 %v4366_v7  ;;  %1779 = vmatpush1.msra.mxu1 %v4372_v9 }
 0x4b7   :  { %1709 = vmatprep.subr.mxu0 %v4378_v28  ;;  %1780 = vmatprep.subr.mxu1 %v4384_v27 }
 0x4b8   :  { %1710 = vmatpush1.msra.mxu0 %v4390_v32  ;;  %1781 = vmatpush1.msra.mxu1 %v4396_v14 }
 0x4b9   :  { %1711 = vmatprep.subr.mxu0 %v4402_v17  ;;  %1782 = vmatprep.subr.mxu1 %v4408_v36 }
 0x4ba   :  { %1712 = vmatpush1.msra.mxu0 %v4414_v40  ;;  %1783 = vmatpush1.msra.mxu1 %v4420_v21 }
 0x4bb   :  { %1713 = vmatprep.subr.mxu0 %v4426_v22  ;;  %1784 = vmatprep.subr.mxu1 %v4432_v39 }
 0x4bc   :  { %1714 = vmatpush1.msra.mxu0 %v4438_v44  ;;  %1785 = vmatpush1.msra.mxu1 %v4444_v23 }
 0x4bd   :  { %1715 = vmatprep.subr.mxu0 %v4450_v26  ;;  %1786 = vmatprep.subr.mxu1 %v4456_v48 }
 0x4be   :  { %1716 = vmatpush1.msra.mxu0 %v4462_v52  ;;  %1787 = vmatpush1.msra.mxu1 %v5047_v11 }
 0x4bf   :  { %1717 = vmatprep.subr.mxu0 %v5048_v43  ;;  %1788 = vmatprep.subr.mxu1 %v5049_v29 }
 0x4c0   :  { %1718 = vmatpush1.msra.mxu0 %v5050_v35  ;;  %1789 = vmatpush1.msra.mxu1 %v5051_v55  ;;  %v5069_v55 = vld [vmem:[#allocation51_spill] sm:$0xff] }
 0x4c1   :  { %1719 = vmatprep.subr.mxu0 %v5052_v42  ;;  %1790 = vmatprep.subr.mxu1 %v5053_v37 }
 0x4c2   :  { %1720 = vmatpush1.msra.mxu0 %v5054_v38  ;;  %1791 = vmatpush1.msra.mxu1 %v5055_v47  ;;  %v5065_v47 = vld [vmem:[#allocation4_spill] sm:$0xff] }
 0x4c3   :  { %1721 = vmatprep.subr.mxu0 %v5056_v30  ;;  %1792 = vmatprep.subr.mxu1 %v5057_v49  ;;  %v5066_v30 = vld [vmem:[#allocation5_spill] sm:$0xff] }
 0x4c4   :  { %1722 = vmatpush1.msra.mxu0 %v5058_v51  ;;  %1793 = vmatpush1.msra.mxu1 %v5059_v54  ;;  %v5067_v51 = vld [vmem:[#allocation37_spill] sm:$0xff] }
 0x4c5   :  { %1723 = vmatprep.subr.mxu0 %v5060_v25  ;;  %1794 = vmatprep.subr.mxu1 %v5061_v46  ;;  %v5068_v25 = vld [vmem:[#allocation38_spill] sm:$0xff] }
 0x4c6   :  { %1724 = vmatpush1.msra.mxu0 %v5062_v24  ;;  %1757 = vmatprep.mubr.f32.mxu0 %v5063_v10 }
 0x4c7   :  { %1795 = vmatpush1.msra.mxu1 %v5064_v18  ;;  %1828 = vmatprep.mubr.f32.mxu1 %v5063_v10  ;;  %v5070_v10 = vld [vmem:[#allocation52_spill] sm:$0xff] }
 0x4c8   :  { %1863 = vmatprep.subr.mxu0 %v5065_v47  ;;  %1934 = vmatprep.subr.mxu1 %v5066_v30 }
 0x567   :  { %v1589_v49 = vpop.f32.mrf.mxu0  ;;  %v1660_v24 = vpop.f32.mrf.mxu1 }
 0x568   :  { %v1665_v38 = vadd.f32 %v1589_v49, %v5067_v51  ;;  %v1667_v35 = vadd.f32 %v1660_v24, %v5069_v55  ;;  %v5075_v24 = vld [vmem:[#allocation10_spill] sm:$0xff] }
 0x569   :  { %v1591_v54 = vpop.f32.mrf.mxu0  ;;  %v1662_v18 = vpop.f32.mrf.mxu1 }
 0x56a   :  { %v2220_v37 = vmul.f32 -1.442695, %v1665_v38  ;;  %v1666_v42 = vadd.f32 %v1591_v54, %v5068_v25  ;;  %v2222_v29 = vmul.f32 -1.442695, %v1667_v35  ;;  %v1668_v43 = vadd.f32 %v1662_v18, %v5070_v10  ;;  %v5076_v10 = vld [vmem:[#allocation11_spill] sm:$0xff]  ;;  %v5077_v18 = vld [vmem:[#allocation12_spill] sm:$0xff] }
 0x56c   :  { %2297 = vpow2.f32 %v2220_v37  ;;  %v2221_v46 = vmul.f32 -1.442695, %v1666_v42 }
 0x56e   :  { %2299 = vpow2.f32 %v2221_v46 }
 0x56f   :  { %2301 = vpow2.f32 %v2222_v29 }
 0x570   :  { %2303 = vtanh.f32 %v1668_v43  ;;  %v5073_v43 = vld [vmem:[#allocation8_spill] sm:$0xff] }
 0x579   :  { %v2298_v47 = vpop.eup %2297 }
 0x57a   :  { %v1678_v11 = vadd.f32 1.0, %v2298_v47 }
 0x57b   :  { %v2300_v30 = vpop.eup %2299 }
 0x57c   :  { %2305 = vrcp.f32 %v1678_v11  ;;  %v1679_v49 = vadd.f32 1.0, %v2300_v30  ;;  %v2302_v38 = vpop.eup %2301  ;;  %v5072_v11 = vld [vmem:[#allocation7_spill] sm:$0xff]  ;;  %v5074_v30 = vld [vmem:[#allocation9_spill] sm:$0xff] }
 0x57d   :  { %v2304_v51 = vpop.eup %2303  ;;  %v1680_v25 = vadd.f32 1.0, %v2302_v38  ;;  %v5079_v38 = vld [vmem:[#allocation2_spill] sm:$0xff] }
 0x57e   :  { %2307 = vrcp.f32 %v1679_v49  ;;  %v5078_v49 = vld [vmem:[#allocation13_spill] sm:$0xff] }
 0x57f   :  { %2309 = vrcp.f32 %v1680_v25  ;;  %v5084_v25 = vld [vmem:[#allocation46_spill] sm:$0xff] }
 0x589   :  { %v2306_v37 = vpop.eup %2305 }
 0x58a   :  { %v1689_v42 = vmul.f32 %v2306_v37, %v2304_v51  ;;  %v5080_v51 = vld [vmem:[#allocation3_spill] sm:$0xff] }
 0x58b   :  { %v2308_v54 = vpop.eup %2307  ;;  %v5081_v37 = vld [vmem:[#allocation31_spill] sm:$0xff] }
 0x58c   :  { %v1688_v55 = vmul.f32 %v2308_v54, %v4576_v56  ;;  %v2310_v35 = vpop.eup %2309  ;;  %v5071_v56 = vld [vmem:[#allocation6_spill] sm:$0xff]  ;;  %v5083_v54 = vld [vmem:[#allocation45_spill] sm:$0xff] }
 0x58e   :  { %v4650_v46 = vadd.f32 %v1689_v42, %v1688_v55  ;;  %v5082_v42 = vld [vmem:[#allocation32_spill] sm:$0xff]  ;;  %v5085_v55 = vld [vmem:[#allocation14_spill] sm:$0xff] }
 0x590   :  { %2311 = vtanh.f32 %v4650_v46 }
 0x59d   :  { %v2312_v29 = vpop.eup %2311 }
 0x59e   :  { %v1692_v47 = vmul.f32 %v2312_v29, %v2310_v35  ;;  %v5086_v35 = vld [vmem:[#allocation15_spill] sm:$0xff]  ;;  %v5087_v29 = vmov 0.0  }
 0x5a0   :  { %1758 = vmatmul.mubr.f32.vlgmr.msra.gmra.mxu0 %v1692_v47  ;;  %1829 = vmatmul.mubr.f32.vlgmr.msra.gmra.mxu1 %v1692_v47  ;;  %v5088_v47 = vld [vmem:[#allocation16_spill] sm:$0xff] }
 0x5a1   :  { %1864 = vmatpush1.msra.mxu0 %v4198_v41  ;;  %1935 = vmatpush1.msra.mxu1 %v4204_v60 }
 0x5a2   :  { %1865 = vmatprep.subr.mxu0 %v4210_v13  ;;  %1936 = vmatprep.subr.mxu1 %v4216_v33 }
 0x5a3   :  { %1866 = vmatpush1.msra.mxu0 %v4222_v53  ;;  %1937 = vmatpush1.msra.mxu1 %v4228_v0 }
 0x5a4   :  { %1867 = vmatprep.subr.mxu0 %v4234_v50  ;;  %1938 = vmatprep.subr.mxu1 %v4240_v31 }
 0x5a5   :  { %1868 = vmatpush1.msra.mxu0 %v4246_v57  ;;  %1939 = vmatpush1.msra.mxu1 %v4252_v19 }
 0x5a6   :  { %1869 = vmatprep.subr.mxu0 %v4258_v45  ;;  %1940 = vmatprep.subr.mxu1 %v4264_v3 }
 0x5a7   :  { %1870 = vmatpush1.msra.mxu0 %v4270_v8  ;;  %1941 = vmatpush1.msra.mxu1 %v4276_v34 }
 0x5a8   :  { %1871 = vmatprep.subr.mxu0 %v4282_v58  ;;  %1942 = vmatprep.subr.mxu1 %v4288_v63 }
 0x5a9   :  { %1872 = vmatpush1.msra.mxu0 %v4294_v59  ;;  %1943 = vmatpush1.msra.mxu1 %v4300_v2 }
 0x5aa   :  { %1873 = vmatprep.subr.mxu0 %v4306_v1  ;;  %1944 = vmatprep.subr.mxu1 %v4312_v5 }
 0x5ab   :  { %1874 = vmatpush1.msra.mxu0 %v4318_v61  ;;  %1945 = vmatpush1.msra.mxu1 %v4324_v62 }
 0x5ac   :  { %1875 = vmatprep.subr.mxu0 %v4330_v12  ;;  %1946 = vmatprep.subr.mxu1 %v4336_v16 }
 0x5ad   :  { %1876 = vmatpush1.msra.mxu0 %v4342_v4  ;;  %1947 = vmatpush1.msra.mxu1 %v4348_v6 }
 0x5ae   :  { %1877 = vmatprep.subr.mxu0 %v4354_v15  ;;  %1948 = vmatprep.subr.mxu1 %v4360_v20 }
 0x5af   :  { %1878 = vmatpush1.msra.mxu0 %v4366_v7  ;;  %1949 = vmatpush1.msra.mxu1 %v4372_v9 }
 0x5b0   :  { %1879 = vmatprep.subr.mxu0 %v4378_v28  ;;  %1950 = vmatprep.subr.mxu1 %v4384_v27 }
 0x5b1   :  { %1880 = vmatpush1.msra.mxu0 %v4390_v32  ;;  %1951 = vmatpush1.msra.mxu1 %v4396_v14 }
 0x5b2   :  { %1881 = vmatprep.subr.mxu0 %v4402_v17  ;;  %1952 = vmatprep.subr.mxu1 %v4408_v36 }
 0x5b3   :  { %1882 = vmatpush1.msra.mxu0 %v4414_v40  ;;  %1953 = vmatpush1.msra.mxu1 %v4420_v21 }
 0x5b4   :  { %1883 = vmatprep.subr.mxu0 %v4426_v22  ;;  %1954 = vmatprep.subr.mxu1 %v4432_v39 }
 0x5b5   :  { %1884 = vmatpush1.msra.mxu0 %v4438_v44  ;;  %1955 = vmatpush1.msra.mxu1 %v4444_v23 }
 0x5b6   :  { %1885 = vmatprep.subr.mxu0 %v4450_v26  ;;  %1956 = vmatprep.subr.mxu1 %v4456_v48 }
 0x5b7   :  { %1886 = vmatpush1.msra.mxu0 %v4462_v52  ;;  %1957 = vmatpush1.msra.mxu1 %v5071_v56 }
 0x5b8   :  { %1887 = vmatprep.subr.mxu0 %v5072_v11  ;;  %1958 = vmatprep.subr.mxu1 %v5073_v43 }
 0x5b9   :  { %1888 = vmatpush1.msra.mxu0 %v5074_v30  ;;  %1959 = vmatpush1.msra.mxu1 %v5075_v24  ;;  %v5093_v24 = vld [vmem:[#allocation53_spill] sm:$0xff] }
 0x5ba   :  { %1889 = vmatprep.subr.mxu0 %v5076_v10  ;;  %1960 = vmatprep.subr.mxu1 %v5077_v18 }
 0x5bb   :  { %1890 = vmatpush1.msra.mxu0 %v5078_v49  ;;  %1961 = vmatpush1.msra.mxu1 %v5079_v38  ;;  %v5089_v38 = vld [vmem:[#allocation4_spill] sm:$0xff] }
 0x5bc   :  { %1891 = vmatprep.subr.mxu0 %v5080_v51  ;;  %1962 = vmatprep.subr.mxu1 %v5081_v37  ;;  %v5090_v51 = vld [vmem:[#allocation5_spill] sm:$0xff] }
 0x5bd   :  { %1892 = vmatpush1.msra.mxu0 %v5082_v42  ;;  %1963 = vmatpush1.msra.mxu1 %v5083_v54  ;;  %v5091_v42 = vld [vmem:[#allocation39_spill] sm:$0xff] }
 0x5be   :  { %1893 = vmatprep.subr.mxu0 %v5084_v25  ;;  %1964 = vmatprep.subr.mxu1 %v5085_v55  ;;  %v5092_v25 = vld [vmem:[#allocation40_spill] sm:$0xff] }
 0x5bf   :  { %1894 = vmatpush1.msra.mxu0 %v5086_v35  ;;  %1927 = vmatprep.mubr.f32.mxu0 %v5087_v29 }
 0x5c0   :  { %1965 = vmatpush1.msra.mxu1 %v5088_v47  ;;  %1998 = vmatprep.mubr.f32.mxu1 %v5087_v29  ;;  %v5094_v29 = vld [vmem:[#allocation54_spill] sm:$0xff] }
 0x5c1   :  { %2033 = vmatprep.subr.mxu0 %v5089_v38  ;;  %2104 = vmatprep.subr.mxu1 %v5090_v51 }
 0x660   :  { %v1759_v37 = vpop.f32.mrf.mxu0  ;;  %v1830_v35 = vpop.f32.mrf.mxu1 }
 0x661   :  { %v1835_v49 = vadd.f32 %v1759_v37, %v5091_v42  ;;  %v1837_v30 = vadd.f32 %v1830_v35, %v5093_v24 }
 0x662   :  { %v1761_v54 = vpop.f32.mrf.mxu0  ;;  %v1832_v47 = vpop.f32.mrf.mxu1 }
 0x663   :  { %v2223_v18 = vmul.f32 -1.442695, %v1835_v49  ;;  %v1836_v10 = vadd.f32 %v1761_v54, %v5092_v25  ;;  %v2225_v43 = vmul.f32 -1.442695, %v1837_v30  ;;  %v1838_v11 = vadd.f32 %v1832_v47, %v5094_v29  ;;  %v5117_v47 = vld [vmem:[#allocation43_spill] sm:$0xff] }
 0x665   :  { %2313 = vpow2.f32 %v2223_v18  ;;  %v2224_v55 = vmul.f32 -1.442695, %v1836_v10 }
 0x667   :  { %2315 = vpow2.f32 %v2224_v55 }
 0x668   :  { %2317 = vpow2.f32 %v2225_v43 }
 0x669   :  { %2319 = vtanh.f32 %v1838_v11 }
 0x672   :  { %v2314_v38 = vpop.eup %2313 }
 0x673   :  { %v1848_v56 = vadd.f32 1.0, %v2314_v38 }
 0x674   :  { %v2316_v51 = vpop.eup %2315 }
 0x675   :  { %2321 = vrcp.f32 %v1848_v56  ;;  %v1849_v37 = vadd.f32 1.0, %v2316_v51  ;;  %v2318_v49 = vpop.eup %2317 }
 0x676   :  { %v2320_v42 = vpop.eup %2319  ;;  %v1850_v25 = vadd.f32 1.0, %v2318_v49  ;;  %v5118_v49 = vld [vmem:[#allocation44_spill] sm:$0xff] }
 0x677   :  { %2323 = vrcp.f32 %v1849_v37 }
 0x678   :  { %2325 = vrcp.f32 %v1850_v25 }
 0x682   :  { %v2322_v18 = vpop.eup %2321 }
 0x683   :  { %v1859_v10 = vmul.f32 %v2322_v18, %v2320_v42 }
 0x684   :  { %v2324_v54 = vpop.eup %2323 }
 0x685   :  { %v1858_v24 = vmul.f32 %v2324_v54, %v4650_v46  ;;  %v2326_v30 = vpop.eup %2325  ;;  %v5119_v54 = vld [vmem:[#allocation57_spill] sm:$0xff] }
 0x687   :  { %v4724_v55 = vadd.f32 %v1859_v10, %v1858_v24 }
 0x689   :  { %2327 = vtanh.f32 %v4724_v55 }
 0x696   :  { %v2328_v43 = vpop.eup %2327 }
 0x697   :  { %v1862_v35 = vmul.f32 %v2328_v43, %v2326_v30  ;;  %v5120_v30 = vld [vmem:[#allocation58_spill] sm:$0xff] }
 0x699   :  { %1928 = vmatmul.mubr.f32.vlgmr.msra.gmra.mxu0 %v1862_v35  ;;  %1999 = vmatmul.mubr.f32.vlgmr.msra.gmra.mxu1 %v1862_v35 }
 0x69a   :  { %2034 = vmatpush1.msra.mxu0 %v4198_v41  ;;  %2105 = vmatpush1.msra.mxu1 %v4204_v60  ;;  %v5095_v41 = vld [vmem:[#allocation6_spill] sm:$0xff]  ;;  %v5096_v60 = vld [vmem:[#allocation7_spill] sm:$0xff] }
 0x69b   :  { %2035 = vmatprep.subr.mxu0 %v4210_v13  ;;  %2106 = vmatprep.subr.mxu1 %v4216_v33  ;;  %v5097_v13 = vld [vmem:[#allocation8_spill] sm:$0xff]  ;;  %v5098_v33 = vld [vmem:[#allocation9_spill] sm:$0xff] }
 0x69c   :  { %2036 = vmatpush1.msra.mxu0 %v4222_v53  ;;  %2107 = vmatpush1.msra.mxu1 %v4228_v0  ;;  %v5099_v53 = vld [vmem:[#allocation10_spill] sm:$0xff]  ;;  %v5100_v0 = vld [vmem:[#allocation11_spill] sm:$0xff] }
 0x69d   :  { %2037 = vmatprep.subr.mxu0 %v4234_v50  ;;  %2108 = vmatprep.subr.mxu1 %v4240_v31  ;;  %v5101_v50 = vld [vmem:[#allocation12_spill] sm:$0xff]  ;;  %v5102_v31 = vld [vmem:[#allocation13_spill] sm:$0xff] }
 0x69e   :  { %2038 = vmatpush1.msra.mxu0 %v4246_v57  ;;  %2109 = vmatpush1.msra.mxu1 %v4252_v19  ;;  %v5103_v57 = vld [vmem:[#allocation2_spill] sm:$0xff]  ;;  %v5104_v19 = vld [vmem:[#allocation3_spill] sm:$0xff] }
 0x69f   :  { %2039 = vmatprep.subr.mxu0 %v4258_v45  ;;  %2110 = vmatprep.subr.mxu1 %v4264_v3  ;;  %v5105_v45 = vld [vmem:[#allocation31_spill] sm:$0xff]  ;;  %v5106_v3 = vld [vmem:[#allocation32_spill] sm:$0xff] }
 0x6a0   :  { %2040 = vmatpush1.msra.mxu0 %v4270_v8  ;;  %2111 = vmatpush1.msra.mxu1 %v4276_v34  ;;  %v5107_v8 = vld [vmem:[#allocation45_spill] sm:$0xff]  ;;  %v5108_v34 = vld [vmem:[#allocation46_spill] sm:$0xff] }
 0x6a1   :  { %2041 = vmatprep.subr.mxu0 %v4282_v58  ;;  %2112 = vmatprep.subr.mxu1 %v4288_v63  ;;  %v5109_v58 = vld [vmem:[#allocation14_spill] sm:$0xff]  ;;  %v5110_v63 = vld [vmem:[#allocation15_spill] sm:$0xff] }
 0x6a2   :  { %2042 = vmatpush1.msra.mxu0 %v4294_v59  ;;  %2113 = vmatpush1.msra.mxu1 %v4300_v2  ;;  %v5111_v59 = vmov 0.0   ;;  %v5112_v2 = vld [vmem:[#allocation16_spill] sm:$0xff] }
 0x6a3   :  { %2043 = vmatprep.subr.mxu0 %v4306_v1  ;;  %2114 = vmatprep.subr.mxu1 %v4312_v5  ;;  %v5113_v5 = vld [vmem:[#allocation41_spill] sm:$0xff] }
 0x6a4   :  { %2044 = vmatpush1.msra.mxu0 %v4318_v61  ;;  %2115 = vmatpush1.msra.mxu1 %v4324_v62 }
 0x6a5   :  { %2045 = vmatprep.subr.mxu0 %v4330_v12  ;;  %2116 = vmatprep.subr.mxu1 %v4336_v16  ;;  %v5114_v16 = vld [vmem:[#allocation42_spill] sm:$0xff] }
 0x6a6   :  { %2046 = vmatpush1.msra.mxu0 %v4342_v4  ;;  %2117 = vmatpush1.msra.mxu1 %v4348_v6 }
 0x6a7   :  { %2047 = vmatprep.subr.mxu0 %v4354_v15  ;;  %2118 = vmatprep.subr.mxu1 %v4360_v20  ;;  %v5115_v20 = vld [vmem:[#allocation55_spill] sm:$0xff] }
 0x6a8   :  { %2048 = vmatpush1.msra.mxu0 %v4366_v7  ;;  %2119 = vmatpush1.msra.mxu1 %v4372_v9 }
 0x6a9   :  { %2049 = vmatprep.subr.mxu0 %v4378_v28  ;;  %2120 = vmatprep.subr.mxu1 %v4384_v27  ;;  %v5116_v27 = vld [vmem:[#allocation56_spill] sm:$0xff] }
 0x6aa   :  { %2050 = vmatpush1.msra.mxu0 %v4390_v32  ;;  %2121 = vmatpush1.msra.mxu1 %v4396_v14 }
 0x6ab   :  { %2051 = vmatprep.subr.mxu0 %v4402_v17  ;;  %2122 = vmatprep.subr.mxu1 %v4408_v36 }
 0x6ac   :  { %2052 = vmatpush1.msra.mxu0 %v4414_v40  ;;  %2123 = vmatpush1.msra.mxu1 %v4420_v21 }
 0x6ad   :  { %2053 = vmatprep.subr.mxu0 %v4426_v22  ;;  %2124 = vmatprep.subr.mxu1 %v4432_v39 }
 0x6ae   :  { %2054 = vmatpush1.msra.mxu0 %v4438_v44  ;;  %2125 = vmatpush1.msra.mxu1 %v4444_v23 }
 0x6af   :  { %2055 = vmatprep.subr.mxu0 %v4450_v26  ;;  %2126 = vmatprep.subr.mxu1 %v4456_v48 }
 0x6b0   :  { %2056 = vmatpush1.msra.mxu0 %v4462_v52  ;;  %2127 = vmatpush1.msra.mxu1 %v5095_v41 }
 0x6b1   :  { %2057 = vmatprep.subr.mxu0 %v5096_v60  ;;  %2128 = vmatprep.subr.mxu1 %v5097_v13 }
 0x6b2   :  { %2058 = vmatpush1.msra.mxu0 %v5098_v33  ;;  %2129 = vmatpush1.msra.mxu1 %v5099_v53 }
 0x6b3   :  { %2059 = vmatprep.subr.mxu0 %v5100_v0  ;;  %2130 = vmatprep.subr.mxu1 %v5101_v50 }
 0x6b4   :  { %2060 = vmatpush1.msra.mxu0 %v5102_v31  ;;  %2131 = vmatpush1.msra.mxu1 %v5103_v57 }
 0x6b5   :  { %2061 = vmatprep.subr.mxu0 %v5104_v19  ;;  %2132 = vmatprep.subr.mxu1 %v5105_v45 }
 0x6b6   :  { %2062 = vmatpush1.msra.mxu0 %v5106_v3  ;;  %2133 = vmatpush1.msra.mxu1 %v5107_v8 }
 0x6b7   :  { %2063 = vmatprep.subr.mxu0 %v5108_v34  ;;  %2134 = vmatprep.subr.mxu1 %v5109_v58 }
 0x6b8   :  { %2064 = vmatpush1.msra.mxu0 %v5110_v63  ;;  %2097 = vmatprep.mubr.f32.mxu0 %v5111_v59 }
 0x6b9   :  { %2135 = vmatpush1.msra.mxu1 %v5112_v2  ;;  %2168 = vmatprep.mubr.f32.mxu1 %v5111_v59 }
 0x759   :  { %v1929_v1 = vpop.f32.mrf.mxu0  ;;  %v2000_v15 = vpop.f32.mrf.mxu1 }
 0x75a   :  { %v2005_v61 = vadd.f32 %v1929_v1, %v5113_v5  ;;  %v2007_v7 = vadd.f32 %v2000_v15, %v5115_v20 }
 0x75b   :  { %v1931_v62 = vpop.f32.mrf.mxu0  ;;  %v2002_v9 = vpop.f32.mrf.mxu1 }
 0x75c   :  { %v2226_v12 = vmul.f32 -1.442695, %v2005_v61  ;;  %v2006_v4 = vadd.f32 %v1931_v62, %v5114_v16  ;;  %v2228_v28 = vmul.f32 -1.442695, %v2007_v7  ;;  %v2008_v32 = vadd.f32 %v2002_v9, %v5116_v27 }
 0x75e   :  { %2329 = vpow2.f32 %v2226_v12  ;;  %v2227_v6 = vmul.f32 -1.442695, %v2006_v4 }
 0x760   :  { %2331 = vpow2.f32 %v2227_v6 }
 0x761   :  { %2333 = vpow2.f32 %v2228_v28 }
 0x762   :  { %2335 = vtanh.f32 %v2008_v32 }
 0x76b   :  { %v2330_v14 = vpop.eup %2329 }
 0x76c   :  { %v2018_v17 = vadd.f32 1.0, %v2330_v14 }
 0x76d   :  { %v2332_v36 = vpop.eup %2331 }
 0x76e   :  { %2337 = vrcp.f32 %v2018_v17  ;;  %v2019_v40 = vadd.f32 1.0, %v2332_v36  ;;  %v2334_v21 = vpop.eup %2333 }
 0x76f   :  { %v2336_v22 = vpop.eup %2335  ;;  %v2020_v26 = vadd.f32 1.0, %v2334_v21 }
 0x770   :  { %2339 = vrcp.f32 %v2019_v40 }
 0x771   :  { %2341 = vrcp.f32 %v2020_v26 }
 0x77b   :  { %v2338_v39 = vpop.eup %2337 }
 0x77c   :  { %v2029_v44 = vmul.f32 %v2338_v39, %v2336_v22 }
 0x77d   :  { %v2340_v23 = vpop.eup %2339 }
 0x77e   :  { %v2028_v48 = vmul.f32 %v2340_v23, %v4724_v55  ;;  %v2342_v46 = vpop.eup %2341 }
 0x780   :  { %v2030_v52 = vadd.f32 %v2029_v44, %v2028_v48 }
 0x782   :  { %2343 = vtanh.f32 %v2030_v52 }
 0x78f   :  { %v2344_v56 = vpop.eup %2343 }
 0x790   :  { %v2032_v11 = vmul.f32 %v2344_v56, %v2342_v46 }
 0x792   :  { %2098 = vmatmul.mubr.f32.vlgmr.msra.gmra.mxu0 %v2032_v11  ;;  %2169 = vmatmul.mubr.f32.vlgmr.msra.gmra.mxu1 %v2032_v11 }
 0x852   :  { %v2099_v29 = vpop.f32.mrf.mxu0  ;;  %v2170_v10 = vpop.f32.mrf.mxu1 }
 0x853   :  { %v2175_v38 = vadd.f32 %v2099_v29, %v5117_v47  ;;  %v2177_v25 = vadd.f32 %v2170_v10, %v5119_v54 }
 0x854   :  { %v2101_v51 = vpop.f32.mrf.mxu0  ;;  %v2172_v24 = vpop.f32.mrf.mxu1 }
 0x855   :  { %v2229_v37 = vmul.f32 -1.442695, %v2175_v38  ;;  %v2176_v42 = vadd.f32 %v2101_v51, %v5118_v49  ;;  %v2231_v55 = vmul.f32 -1.442695, %v2177_v25  ;;  %v2178_v43 = vadd.f32 %v2172_v24, %v5120_v30 }
 0x857   :  { %2345 = vpow2.f32 %v2229_v37  ;;  %v2230_v18 = vmul.f32 -1.442695, %v2176_v42 }
 0x859   :  { %2347 = vpow2.f32 %v2230_v18 }
 0x85a   :  { %2349 = vpow2.f32 %v2231_v55 }
 0x85b   :  { %2351 = vtanh.f32 %v2178_v43 }
 0x864   :  { %v2346_v35 = vpop.eup %2345 }
 0x865   :  { %v2188_v41 = vadd.f32 1.0, %v2346_v35 }
 0x866   :  { %v2348_v60 = vpop.eup %2347 }
 0x867   :  { %2353 = vrcp.f32 %v2188_v41  ;;  %v2189_v13 = vadd.f32 1.0, %v2348_v60  ;;  %v2350_v33 = vpop.eup %2349 }
 0x868   :  { %v2352_v53 = vpop.eup %2351  ;;  %v2190_v57 = vadd.f32 1.0, %v2350_v33 }
 0x869   :  { %2355 = vrcp.f32 %v2189_v13 }
 0x86a   :  { %2357 = vrcp.f32 %v2190_v57 }
 0x874   :  { %v2354_v0 = vpop.eup %2353 }
 0x875   :  { %v2199_v50 = vmul.f32 %v2354_v0, %v2352_v53 }
 0x876   :  { %v2356_v31 = vpop.eup %2355 }
 0x877   :  { %v2198_v19 = vmul.f32 %v2356_v31, %v2030_v52  ;;  %v2358_v3 = vpop.eup %2357 }
 0x879   :  { %v2200_v45 = vadd.f32 %v2199_v50, %v2198_v19 }
 0x87b   :  { %2359 = vtanh.f32 %v2200_v45 }
 0x888   :  { %v2360_v8 = vpop.eup %2359 }
 0x889   :  { %v2202_v34 = vmul.f32 %v2360_v8, %v2358_v3 }
 0x88b   :  { %2203 = vst [vmem:[%s4807_s4] sm:$0xff] %v2202_v34 }

</bundles_post_ra>
